<compile_context>
chip_gen: v7x
topology: tpu7x:2x2x1
jax: 0.10.0
libtpu: 0.0.40
codegen_flags: <defaults>
</compile_context>

<pallas_src>
import numpy as np
import jax
import jax.numpy as jnp
from jax import lax
from jax.experimental import pallas as pl
from jax.experimental.pallas import tpu as pltpu


# ---------------------------------------------------------------------------
# model dimensions (small, TPU-tile friendly)
# ---------------------------------------------------------------------------
F_IN = 128            # input acoustic feature dim
D_HID = 128           # backbone / decoder hidden dim
D_MASK = 128          # mask-feature dim (pixel decoder output)
NUM_QUERIES = 8       # (module default is 50; small synthetic value here)
NUM_CLASSES_P1 = 8    # num_classes + 1 ("no object" class included)
C1_PAD = 128          # class-head lane padding (lane-dense store)
Q_PAD = ((NUM_QUERIES + 7) // 8) * 8   # sublane-aligned query count
NEG_INF = -1e30


def _round_up(x, m):
    return ((x + m - 1) // m) * m


# ---------------------------------------------------------------------------
# MERGED kernel: whole forward for one batch item (T_pad resident in VMEM).
# grid = (B,). One HBM read of x, one MXU pass per weight, bf16 mask writeback.
# ---------------------------------------------------------------------------
def _merged_kernel(
    ilens_ref,                           # SMEM (B,) int32 (scalar prefetch)
    x_ref,                               # (1, Tp, F) bf16
    w_enc_ref, b_enc_ref,                # (F, D) bf16, (1, D) f32
    w_f_ref, b_f_ref,                    # (D, D) bf16, (1, D) f32
    w_mf_ref, b_mf_ref,                  # (D, Dm) bf16, (1, Dm) f32
    q0_ref,                              # (Qp, D) bf16
    w_heads_ref, b_heads_ref,            # (D, 2*128) bf16, (1, 2*128) f32
    logits_ref,                          # out (1, Qp, 128) f32
    masks_ref,                           # out (1, Qp, Tp)  bf16
):
    b = pl.program_id(0)
    ilen = ilens_ref[b]

    x = x_ref[0]                                              # (Tp, F) bf16
    Tp = x.shape[0]
    frame_valid = (lax.broadcasted_iota(jnp.int32, (Tp, 1), 0) < ilen
                   ).astype(jnp.float32)                      # (Tp, 1)
    key_valid = (lax.broadcasted_iota(jnp.int32, (1, Tp), 1) < ilen
                 ).astype(jnp.float32)                        # (1, Tp)

    # ---- backbone: per-frame linear encoder + ReLU, padded frames zeroed ---
    h = jnp.dot(x, w_enc_ref[...], preferred_element_type=jnp.float32)
    h = jnp.maximum(h + b_enc_ref[...], 0.0) * frame_valid
    h_b = h.astype(jnp.bfloat16)

    # ---- pixel decoder: transformer features + mask features --------------
    feat_b = (jnp.dot(h_b, w_f_ref[...], preferred_element_type=jnp.float32)
              + b_f_ref[...]).astype(jnp.bfloat16)            # (Tp, D)
    mask_feat_b = ((jnp.dot(h_b, w_mf_ref[...],
                            preferred_element_type=jnp.float32)
                    + b_mf_ref[...]) * frame_valid).astype(jnp.bfloat16)

    # ---- query cross-attention pooling (full softmax, all T resident) -----
    scale = jnp.float32(1.0) / jnp.sqrt(jnp.float32(D_HID))
    scores = lax.dot_general(
        q0_ref[...], feat_b,
        dimension_numbers=(((1,), (1,)), ((), ())),
        preferred_element_type=jnp.float32) * scale           # (Qp, Tp)
    m = jnp.max(scores, axis=-1, keepdims=True)
    p = jnp.exp(scores - m) * key_valid                       # zero padded keys
    l = jnp.sum(p, axis=-1, keepdims=True)
    inv_l = pl.reciprocal(jnp.maximum(l, 1e-20), approx=True) # ilen==0 safe
    q_out = jnp.dot(p.astype(jnp.bfloat16), feat_b,
                    preferred_element_type=jnp.float32) * inv_l  # (Qp, D)

    # ---- fused [class | mask-embed] heads in one MXU pass ------------------
    heads = jnp.dot(q_out.astype(jnp.bfloat16), w_heads_ref[...],
                    preferred_element_type=jnp.float32) + b_heads_ref[...]
    logits_ref[0] = heads[:, :C1_PAD]
    mask_embed_b = heads[:, C1_PAD:].astype(jnp.bfloat16)     # (Qp, Dm)

    masks_ref[0] = lax.dot_general(
        mask_embed_b, mask_feat_b,
        dimension_numbers=(((1,), (1,)), ((), ())),
        preferred_element_type=jnp.float32).astype(jnp.bfloat16)


# ---------------------------------------------------------------------------
# TILED path, kernel A: backbone + flash-style online-softmax query pooling,
# heads matmul fused into the t==last finalize. grid=(B, n_t), T="arbitrary".
# ---------------------------------------------------------------------------
def _attn_pool_heads_kernel(
    ilens_ref,                           # SMEM (B,) int32
    x_ref,                               # (1, Tt, F) bf16
    w_enc_ref, b_enc_ref,                # (F, D) bf16, (1, D) f32
    w_f_ref, b_f_ref,                    # (D, D) bf16, (1, D) f32
    q0_ref,                              # (Qp, D) bf16
    w_heads_ref, b_heads_ref,            # (D, 2*128) bf16, (1, 2*128) f32
    logits_ref,                          # out (1, Qp, 128) f32
    membed_ref,                          # out (1, Qp, Dm)  f32
    m_sc, l_sc, acc_sc,                  # VMEM scratch (Qp,1),(Qp,1),(Qp,D) f32
):
    b = pl.program_id(0)
    t = pl.program_id(1)
    n_t = pl.num_programs(1)
    ilen = ilens_ref[b]

    @pl.when(t == 0)
    def _():
        m_sc[...] = jnp.full_like(m_sc, NEG_INF)
        l_sc[...] = jnp.zeros_like(l_sc)
        acc_sc[...] = jnp.zeros_like(acc_sc)

    x = x_ref[0]                                              # (Tt, F) bf16
    Tt = x.shape[0]
    frame_valid = ((t * Tt + lax.broadcasted_iota(jnp.int32, (Tt, 1), 0)) < ilen
                   ).astype(jnp.float32)
    key_valid = ((t * Tt + lax.broadcasted_iota(jnp.int32, (1, Tt), 1)) < ilen
                 ).astype(jnp.float32)

    # backbone
    h = jnp.dot(x, w_enc_ref[...], preferred_element_type=jnp.float32)
    h = jnp.maximum(h + b_enc_ref[...], 0.0) * frame_valid
    h_b = h.astype(jnp.bfloat16)

    # pixel decoder transformer features for this tile
    feat_b = (jnp.dot(h_b, w_f_ref[...], preferred_element_type=jnp.float32)
              + b_f_ref[...]).astype(jnp.bfloat16)

    # scores (contract feature dim; no transpose materialized)
    scale = jnp.float32(1.0) / jnp.sqrt(jnp.float32(D_HID))
    scores = lax.dot_general(
        q0_ref[...], feat_b,
        dimension_numbers=(((1,), (1,)), ((), ())),
        preferred_element_type=jnp.float32) * scale           # (Qp, Tt)

    # online softmax accumulation (single mask application: zero p on pad keys)
    m_prev = m_sc[...]
    m_new = jnp.maximum(m_prev, jnp.max(scores, axis=-1, keepdims=True))
    alpha = jnp.exp(m_prev - m_new)
    p = jnp.exp(scores - m_new) * key_valid
    l_sc[...] = alpha * l_sc[...] + jnp.sum(p, axis=-1, keepdims=True)
    acc_sc[...] = alpha * acc_sc[...] + jnp.dot(
        p.astype(jnp.bfloat16), feat_b, preferred_element_type=jnp.float32)
    m_sc[...] = m_new

    @pl.when(t == n_t - 1)
    def _():
        inv_l = pl.reciprocal(jnp.maximum(l_sc[...], 1e-20), approx=True)
        q_out = acc_sc[...] * inv_l                           # (Qp, D)
        heads = jnp.dot(q_out.astype(jnp.bfloat16), w_heads_ref[...],
                        preferred_element_type=jnp.float32) + b_heads_ref[...]
        logits_ref[0] = heads[:, :C1_PAD]
        membed_ref[0] = heads[:, C1_PAD:]


# ---------------------------------------------------------------------------
# TILED path, kernel B: per-tile mask features + mask logits only.
# No heads matmul, no revisited outputs -> grid ("parallel", "parallel").
# ---------------------------------------------------------------------------
def _mask_tile_kernel(
    ilens_ref,                           # SMEM (B,) int32
    x_ref,                               # (1, Tt, F) bf16
    membed_ref,                          # (1, Qp, Dm) f32
    w_enc_ref, b_enc_ref,                # (F, D) bf16, (1, D) f32
    w_mf_ref, b_mf_ref,                  # (D, Dm) bf16, (1, Dm) f32
    masks_ref,                           # out (1, Qp, Tt) bf16
):
    b = pl.program_id(0)
    t = pl.program_id(1)
    ilen = ilens_ref[b]

    x = x_ref[0]
    Tt = x.shape[0]
    frame_valid = ((t * Tt + lax.broadcasted_iota(jnp.int32, (Tt, 1), 0)) < ilen
                   ).astype(jnp.float32)

    h = jnp.dot(x, w_enc_ref[...], preferred_element_type=jnp.float32)
    h = jnp.maximum(h + b_enc_ref[...], 0.0) * frame_valid
    h_b = h.astype(jnp.bfloat16)

    mask_feat_b = ((jnp.dot(h_b, w_mf_ref[...],
                            preferred_element_type=jnp.float32)
                    + b_mf_ref[...]) * frame_valid).astype(jnp.bfloat16)

    mask_embed_b = membed_ref[0].astype(jnp.bfloat16)         # (Qp, Dm)
    masks_ref[0] = lax.dot_general(
        mask_embed_b, mask_feat_b,
        dimension_numbers=(((1,), (1,)), ((), ())),
        preferred_element_type=jnp.float32).astype(jnp.bfloat16)


# ---------------------------------------------------------------------------
# weight prep (bf16 at the pallas boundary, fused + lane-padded heads, Q pad)
# ---------------------------------------------------------------------------
def _prep_weights(params):
    w_enc = params["w_enc"].astype(jnp.bfloat16)
    w_f = params["w_f"].astype(jnp.bfloat16)
    w_mf = params["w_mf"].astype(jnp.bfloat16)
    q0 = jnp.pad(params["q0"],
                 ((0, Q_PAD - NUM_QUERIES), (0, 0))).astype(jnp.bfloat16)
    w_cls_pad = jnp.pad(params["w_cls"], ((0, 0), (0, C1_PAD - NUM_CLASSES_P1)))
    b_cls_pad = jnp.pad(params["b_cls"], ((0, 0), (0, C1_PAD - NUM_CLASSES_P1)))
    w_heads = jnp.concatenate([w_cls_pad, params["w_me"]],
                              axis=1).astype(jnp.bfloat16)    # (D, 256)
    b_heads = jnp.concatenate([b_cls_pad, params["b_me"]], axis=1)  # (1, 256)
    return (w_enc, params["b_enc"], w_f, params["b_f"],
            w_mf, params["b_mf"], q0, w_heads, b_heads)


# ---------------------------------------------------------------------------
# wrapper: pad/bucket on host, pick merged vs tiled path, launch pallas_calls
# ---------------------------------------------------------------------------
def eend_m2f_forward_model(src_list, params, *, merge_t_max=4096, t_tile=2048):
    """Mirrors EendM2F.forward_model for a list of (T_i, F) frame tensors."""
    assert t_tile % 128 == 0
    B = len(src_list)
    lens = [int(s.shape[0]) for s in src_list]
    max_len = max(lens)
    ilens = jnp.asarray(np.asarray(lens, np.int32))

    merged = max_len <= merge_t_max
    if merged:
        # bucketed padding: lane-dense stores + bounded set of compiled shapes
        t_pad = _round_up(max_len, 128) if max_len <= 512 else _round_up(max_len, 512)
        n_t = 1
    else:
        t_pad = _round_up(max_len, t_tile)
        n_t = t_pad // t_tile

    # host-side padding into one buffer (pad_sequence(..., padding_value=-1))
    padded_np = np.full((B, t_pad, F_IN), -1.0, dtype=np.float32)
    for i, s in enumerate(src_list):
        padded_np[i, :lens[i]] = np.asarray(s, dtype=np.float32)
    padded = jnp.asarray(padded_np).astype(jnp.bfloat16)       # (B, Tp, F) bf16

    (w_enc, b_enc, w_f, b_f, w_mf, b_mf, q0p, w_heads, b_heads) = \
        _prep_weights(params)
    D, Dm = D_HID, D_MASK

    def const_spec(shape):
        nd = len(shape)
        return pl.BlockSpec(shape, lambda *_, _nd=nd: (0,) * _nd)

    if merged:
        # ------------ single merged kernel: one HBM read of x --------------
        grid_spec = pltpu.PrefetchScalarGridSpec(
            num_scalar_prefetch=1,
            grid=(B,),
            in_specs=[
                pl.BlockSpec((1, t_pad, F_IN), lambda b, ilens: (b, 0, 0)),
                const_spec((F_IN, D)), const_spec((1, D)),
                const_spec((D, D)), const_spec((1, D)),
                const_spec((D, Dm)), const_spec((1, Dm)),
                const_spec((Q_PAD, D)),
                const_spec((D, 2 * C1_PAD)), const_spec((1, 2 * C1_PAD)),
            ],
            out_specs=[
                pl.BlockSpec((1, Q_PAD, C1_PAD), lambda b, ilens: (b, 0, 0)),
                pl.BlockSpec((1, Q_PAD, t_pad), lambda b, ilens: (b, 0, 0)),
            ],
        )
        logits_pad, masks_pad = pl.pallas_call(
            _merged_kernel,
            grid_spec=grid_spec,
            out_shape=(
                jax.ShapeDtypeStruct((B, Q_PAD, C1_PAD), jnp.float32),
                jax.ShapeDtypeStruct((B, Q_PAD, t_pad), jnp.bfloat16),
            ),
            compiler_params=pltpu.CompilerParams(
                dimension_semantics=("parallel",),
                vmem_limit_bytes=48 * 1024 * 1024),
        )(ilens, padded, w_enc, b_enc, w_f, b_f, w_mf, b_mf, q0p,
          w_heads, b_heads)
    else:
        # ------------ kernel A: attention pooling + heads finalize ---------
        grid_a = pltpu.PrefetchScalarGridSpec(
            num_scalar_prefetch=1,
            grid=(B, n_t),
            in_specs=[
                pl.BlockSpec((1, t_tile, F_IN), lambda b, t, ilens: (b, t, 0)),
                const_spec((F_IN, D)), const_spec((1, D)),
                const_spec((D, D)), const_spec((1, D)),
                const_spec((Q_PAD, D)),
                const_spec((D, 2 * C1_PAD)), const_spec((1, 2 * C1_PAD)),
            ],
            out_specs=[
                pl.BlockSpec((1, Q_PAD, C1_PAD), lambda b, t, ilens: (b, 0, 0)),
                pl.BlockSpec((1, Q_PAD, Dm), lambda b, t, ilens: (b, 0, 0)),
            ],
            scratch_shapes=[
                pltpu.VMEM((Q_PAD, 1), jnp.float32),
                pltpu.VMEM((Q_PAD, 1), jnp.float32),
                pltpu.VMEM((Q_PAD, D), jnp.float32),
            ],
        )
        logits_pad, membed = pl.pallas_call(
            _attn_pool_heads_kernel,
            grid_spec=grid_a,
            out_shape=(
                jax.ShapeDtypeStruct((B, Q_PAD, C1_PAD), jnp.float32),
                jax.ShapeDtypeStruct((B, Q_PAD, Dm), jnp.float32),
            ),
            compiler_params=pltpu.CompilerParams(
                dimension_semantics=("parallel", "arbitrary")),
        )(ilens, padded, w_enc, b_enc, w_f, b_f, q0p, w_heads, b_heads)

        # ------------ kernel B: per-tile mask logits (fully parallel) ------
        grid_b = pltpu.PrefetchScalarGridSpec(
            num_scalar_prefetch=1,
            grid=(B, n_t),
            in_specs=[
                pl.BlockSpec((1, t_tile, F_IN), lambda b, t, ilens: (b, t, 0)),
                pl.BlockSpec((1, Q_PAD, Dm), lambda b, t, ilens: (b, 0, 0)),
                const_spec((F_IN, D)), const_spec((1, D)),
                const_spec((D, Dm)), const_spec((1, Dm)),
            ],
            out_specs=pl.BlockSpec((1, Q_PAD, t_tile),
                                   lambda b, t, ilens: (b, 0, t)),
        )
        masks_pad = pl.pallas_call(
            _mask_tile_kernel,
            grid_spec=grid_b,
            out_shape=jax.ShapeDtypeStruct((B, Q_PAD, t_pad), jnp.bfloat16),
            compiler_params=pltpu.CompilerParams(
                dimension_semantics=("parallel", "parallel")),
        )(ilens, padded, membed, w_enc, b_enc, w_mf, b_mf)

    logits = logits_pad[:, :NUM_QUERIES, :NUM_CLASSES_P1]      # (B, Q, C+1)
    masks = masks_pad[:, :NUM_QUERIES, :max_len]                # (B, Q, T) bf16

    outputs = {
        "pred_logits": logits,                                  # (B, Q, C+1)
        "pred_masks": masks[..., None],                         # (B, Q, T, 1)
    }
    return outputs


def eend_m2f_infer(src_list, params, threshold_discard=0.8, **forward_kwargs):
    """Mirrors EendM2F.infer: sigmoid + threshold + transpose per batch item."""
    outputs = eend_m2f_forward_model(src_list, params, **forward_kwargs)
    probs = jax.nn.sigmoid(outputs["pred_masks"][..., 0].astype(jnp.float32))
    ys_active = []
    for i, s in enumerate(src_list):
        ti = int(s.shape[0])
        ys_active.append((probs[i, :, :ti] >= threshold_discard).T)   # (T_i, Q)
    return ys_active, outputs


# ---------------------------------------------------------------------------
# pure-JAX reference (same bf16-in / f32-accumulate casts) for validation
# ---------------------------------------------------------------------------
def eend_m2f_reference(src_list, params):
    B = len(src_list)
    lens = [int(s.shape[0]) for s in src_list]
    max_len = max(lens)
    ilens = jnp.asarray(np.asarray(lens, np.int32))
    x_np = np.full((B, max_len, F_IN), -1.0, dtype=np.float32)
    for i, s in enumerate(src_list):
        x_np[i, :lens[i]] = np.asarray(s, dtype=np.float32)
    x = jnp.asarray(x_np).astype(jnp.bfloat16)

    fv = (jnp.arange(max_len)[None, :, None] < ilens[:, None, None]
          ).astype(jnp.float32)                                 # (B, T, 1)
    kv = (jnp.arange(max_len)[None, None, :] < ilens[:, None, None]
          ).astype(jnp.float32)                                 # (B, 1, T)

    w_enc = params["w_enc"].astype(jnp.bfloat16)
    w_f = params["w_f"].astype(jnp.bfloat16)
    w_mf = params["w_mf"].astype(jnp.bfloat16)
    w_cls = params["w_cls"].astype(jnp.bfloat16)
    w_me = params["w_me"].astype(jnp.bfloat16)
    q0 = params["q0"].astype(jnp.bfloat16)

    h = jnp.maximum(jnp.einsum("btf,fd->btd", x, w_enc,
                               preferred_element_type=jnp.float32)
                    + params["b_enc"], 0.0) * fv
    h_b = h.astype(jnp.bfloat16)
    feat_b = (jnp.einsum("btd,de->bte", h_b, w_f,
                         preferred_element_type=jnp.float32)
              + params["b_f"]).astype(jnp.bfloat16)
    mask_feat_b = ((jnp.einsum("btd,de->bte", h_b, w_mf,
                               preferred_element_type=jnp.float32)
                    + params["b_mf"]) * fv).astype(jnp.bfloat16)

    scale = 1.0 / jnp.sqrt(jnp.float32(D_HID))
    scores = jnp.einsum("qd,btd->bqt", q0, feat_b,
                        preferred_element_type=jnp.float32) * scale
    scores = jnp.where(kv > 0, scores, -1e30)
    p = jax.nn.softmax(scores, axis=-1) * kv
    q_out_b = jnp.einsum("bqt,bte->bqe", p.astype(jnp.bfloat16), feat_b,
                         preferred_element_type=jnp.float32).astype(jnp.bfloat16)
    logits = jnp.einsum("bqd,dc->bqc", q_out_b, w_cls,
                        preferred_element_type=jnp.float32) + params["b_cls"]
    mask_embed = (jnp.einsum("bqd,de->bqe", q_out_b, w_me,
                             preferred_element_type=jnp.float32)
                  + params["b_me"])
    masks = jnp.einsum("bqe,bte->bqt", mask_embed.astype(jnp.bfloat16),
                       mask_feat_b, preferred_element_type=jnp.float32)
    return logits, masks


# ---------------------------------------------------------------------------
# deterministic parameter init
# ---------------------------------------------------------------------------
def init_params(key):
    ks = jax.random.split(key, 6)

    def w(k, shape, fan_in):
        return jax.random.normal(k, shape, jnp.float32) / jnp.sqrt(jnp.float32(fan_in))

    return {
        "w_enc": w(ks[0], (F_IN, D_HID), F_IN),
        "b_enc": jnp.zeros((1, D_HID), jnp.float32),
        "w_mf": w(ks[1], (D_HID, D_MASK), D_HID),
        "b_mf": jnp.zeros((1, D_MASK), jnp.float32),
        "w_f": w(ks[2], (D_HID, D_HID), D_HID),
        "b_f": jnp.zeros((1, D_HID), jnp.float32),
        "q0": w(ks[3], (NUM_QUERIES, D_HID), D_HID),
        "w_cls": w(ks[4], (D_HID, NUM_CLASSES_P1), D_HID),
        "b_cls": jnp.zeros((1, NUM_CLASSES_P1), jnp.float32),
        "w_me": w(ks[5], (D_HID, D_MASK), D_HID),
        "b_me": jnp.zeros((1, D_MASK), jnp.float32),
    }


if __name__ == "__main__":
    key = jax.random.PRNGKey(0)
    pkey, k1, k2, k3, k4 = jax.random.split(key, 5)
    params = init_params(pkey)

    # --- small ragged batch: MERGED single-kernel path (one HBM read of x) --
    src = [
        jax.random.normal(k1, (16, F_IN), jnp.float32),
        jax.random.normal(k2, (12, F_IN), jnp.float32),
    ]
    ys_active, outputs = eend_m2f_infer(src, params, threshold_discard=0.8)
    jax.block_until_ready(outputs["pred_logits"])
    jax.block_until_ready(outputs["pred_masks"])

    assert outputs["pred_logits"].shape == (2, NUM_QUERIES, NUM_CLASSES_P1)
    assert outputs["pred_masks"].shape == (2, NUM_QUERIES, 16, 1)
    assert ys_active[0].shape == (16, NUM_QUERIES)
    assert ys_active[1].shape == (12, NUM_QUERIES)
    assert bool(jnp.all(jnp.isfinite(outputs["pred_masks"].astype(jnp.float32))))

    ref_logits, ref_masks = eend_m2f_reference(src, params)
    np.testing.assert_allclose(
        np.asarray(outputs["pred_logits"], np.float32),
        np.asarray(ref_logits, np.float32), rtol=0.05, atol=0.1)
    np.testing.assert_allclose(
        np.asarray(outputs["pred_masks"][..., 0].astype(jnp.float32)),
        np.asarray(ref_masks, np.float32), rtol=0.05, atol=0.5)

    # --- longer ragged batch: forced TILED (flash-style) two-kernel path ----
    src_long = [
        jax.random.normal(k3, (300, F_IN), jnp.float32),
        jax.random.normal(k4, (200, F_IN), jnp.float32),
    ]
    ys2, out2 = eend_m2f_infer(src_long, params, threshold_discard=0.8,
                               merge_t_max=0, t_tile=128)
    jax.block_until_ready(out2["pred_masks"])
    assert out2["pred_logits"].shape == (2, NUM_QUERIES, NUM_CLASSES_P1)
    assert out2["pred_masks"].shape == (2, NUM_QUERIES, 300, 1)
    assert ys2[0].shape == (300, NUM_QUERIES)
    assert ys2[1].shape == (200, NUM_QUERIES)

    ref_logits2, ref_masks2 = eend_m2f_reference(src_long, params)
    np.testing.assert_allclose(
        np.asarray(out2["pred_logits"], np.float32),
        np.asarray(ref_logits2, np.float32), rtol=0.05, atol=0.1)
    np.testing.assert_allclose(
        np.asarray(out2["pred_masks"][..., 0].astype(jnp.float32)),
        np.asarray(ref_masks2, np.float32), rtol=0.05, atol=0.5)

    # TODO(synk): criterion (Hungarian matching loss) and calc_diarization_error
    #             require scipy.optimize.linear_sum_assignment on host; skipped.
    print("KERNEL_OK")
</pallas_src>

<mosaic_0001>
module attributes {stable_mosaic.version = 11 : i64} {
  func.func @_merged_kernel(%arg0: i32, %arg1: memref<2xi32, #tpu.memory_space<smem>>, %arg2: memref<1x128x128xbf16, #tpu.memory_space<vmem>>, %arg3: memref<128x128xbf16, #tpu.memory_space<vmem>>, %arg4: memref<1x128xf32, #tpu.memory_space<vmem>>, %arg5: memref<128x128xbf16, #tpu.memory_space<vmem>>, %arg6: memref<1x128xf32, #tpu.memory_space<vmem>>, %arg7: memref<128x128xbf16, #tpu.memory_space<vmem>>, %arg8: memref<1x128xf32, #tpu.memory_space<vmem>>, %arg9: memref<8x128xbf16, #tpu.memory_space<vmem>>, %arg10: memref<128x256xbf16, #tpu.memory_space<vmem>>, %arg11: memref<1x256xf32, #tpu.memory_space<vmem>>, %arg12: memref<1x8x128xf32, #tpu.memory_space<vmem>>, %arg13: memref<1x8x128xbf16, #tpu.memory_space<vmem>>) attributes {dimension_semantics = [#tpu.dimension_semantics<parallel>], iteration_bounds = array<i64: 2>, scalar_prefetch = 1 : i64, scratch_operands = 0 : i64, tpu.core_type = #tpu.core_type<tc>, window_params = [{transform_indices = @transform_0, window_bounds = array<i64: 1, 128, 128>}, {pipeline_mode = #tpu.pipeline_mode<synchronous>, transform_indices = @transform_1, window_bounds = array<i64: 128, 128>}, {pipeline_mode = #tpu.pipeline_mode<synchronous>, transform_indices = @transform_2, window_bounds = array<i64: 1, 128>}, {pipeline_mode = #tpu.pipeline_mode<synchronous>, transform_indices = @transform_3, window_bounds = array<i64: 128, 128>}, {pipeline_mode = #tpu.pipeline_mode<synchronous>, transform_indices = @transform_4, window_bounds = array<i64: 1, 128>}, {pipeline_mode = #tpu.pipeline_mode<synchronous>, transform_indices = @transform_5, window_bounds = array<i64: 128, 128>}, {pipeline_mode = #tpu.pipeline_mode<synchronous>, transform_indices = @transform_6, window_bounds = array<i64: 1, 128>}, {pipeline_mode = #tpu.pipeline_mode<synchronous>, transform_indices = @transform_7, window_bounds = array<i64: 8, 128>}, {pipeline_mode = #tpu.pipeline_mode<synchronous>, transform_indices = @transform_8, window_bounds = array<i64: 128, 256>}, {pipeline_mode = #tpu.pipeline_mode<synchronous>, transform_indices = @transform_9, window_bounds = array<i64: 1, 256>}, {transform_indices = @transform_10, window_bounds = array<i64: 1, 8, 128>}, {transform_indices = @transform_11, window_bounds = array<i64: 1, 8, 128>}]} {
    %0 = arith.index_cast %arg0 : i32 to index
    %1 = memref.load %arg1[%0] : memref<2xi32, #tpu.memory_space<smem>>
    %c0 = arith.constant 0 : index
    %c0_0 = arith.constant 0 : index
    %c0_1 = arith.constant 0 : index
    %2 = vector.load %arg2[%c0, %c0_0, %c0_1] : memref<1x128x128xbf16, #tpu.memory_space<vmem>>, vector<1x128x128xbf16>
    %3 = vector.shape_cast %2 : vector<1x128x128xbf16> to vector<128x128xbf16>
    %4 = tpu.iota {dimensions = array<i32: 0>} : vector<128x1xi32>
    %5 = vector.broadcast %1 : i32 to vector<128x1xi32>
    %6 = arith.cmpi slt, %4, %5 : vector<128x1xi32>
    %7 = arith.extui %6 : vector<128x1xi1> to vector<128x1xi32>
    %8 = arith.sitofp %7 : vector<128x1xi32> to vector<128x1xf32>
    %9 = tpu.iota {dimensions = array<i32: 1>} : vector<1x128xi32>
    %10 = vector.broadcast %1 : i32 to vector<1x128xi32>
    %11 = arith.cmpi slt, %9, %10 : vector<1x128xi32>
    %12 = arith.extui %11 : vector<1x128xi1> to vector<1x128xi32>
    %13 = arith.sitofp %12 : vector<1x128xi32> to vector<1x128xf32>
    %c0_2 = arith.constant 0 : index
    %c0_3 = arith.constant 0 : index
    %14 = vector.load %arg3[%c0_2, %c0_3] : memref<128x128xbf16, #tpu.memory_space<vmem>>, vector<128x128xbf16>
    %cst = arith.constant dense<0.000000e+00> : vector<128x128xf32>
    %15 = tpu.matmul %3, %14, %cst {dimension_numbers = #tpu.dot_dimension_numbers<[1], [0], [0], [1], [0, 0, 1, 1], [], []>} : vector<128x128xbf16>, vector<128x128xbf16>, vector<128x128xf32> -> vector<128x128xf32>
    %c0_4 = arith.constant 0 : index
    %c0_5 = arith.constant 0 : index
    %16 = vector.load %arg4[%c0_4, %c0_5] : memref<1x128xf32, #tpu.memory_space<vmem>>, vector<1x128xf32>
    %17 = vector.broadcast %16 : vector<1x128xf32> to vector<128x128xf32>
    %18 = arith.addf %15, %17 : vector<128x128xf32>
    %cst_6 = arith.constant 0.000000e+00 : f32
    %19 = vector.broadcast %cst_6 : f32 to vector<128x128xf32>
    %20 = arith.maximumf %18, %19 : vector<128x128xf32>
    %21 = vector.broadcast %8 : vector<128x1xf32> to vector<128x128xf32>
    %22 = arith.mulf %20, %21 : vector<128x128xf32>
    %23 = arith.truncf %22 : vector<128x128xf32> to vector<128x128xbf16>
    %c0_7 = arith.constant 0 : index
    %c0_8 = arith.constant 0 : index
    %24 = vector.load %arg5[%c0_7, %c0_8] : memref<128x128xbf16, #tpu.memory_space<vmem>>, vector<128x128xbf16>
    %cst_9 = arith.constant dense<0.000000e+00> : vector<128x128xf32>
    %25 = tpu.matmul %23, %24, %cst_9 {dimension_numbers = #tpu.dot_dimension_numbers<[1], [0], [0], [1], [0, 0, 1, 1], [], []>} : vector<128x128xbf16>, vector<128x128xbf16>, vector<128x128xf32> -> vector<128x128xf32>
    %c0_10 = arith.constant 0 : index
    %c0_11 = arith.constant 0 : index
    %26 = vector.load %arg6[%c0_10, %c0_11] : memref<1x128xf32, #tpu.memory_space<vmem>>, vector<1x128xf32>
    %27 = vector.broadcast %26 : vector<1x128xf32> to vector<128x128xf32>
    %28 = arith.addf %25, %27 : vector<128x128xf32>
    %29 = arith.truncf %28 : vector<128x128xf32> to vector<128x128xbf16>
    %c0_12 = arith.constant 0 : index
    %c0_13 = arith.constant 0 : index
    %30 = vector.load %arg7[%c0_12, %c0_13] : memref<128x128xbf16, #tpu.memory_space<vmem>>, vector<128x128xbf16>
    %cst_14 = arith.constant dense<0.000000e+00> : vector<128x128xf32>
    %31 = tpu.matmul %23, %30, %cst_14 {dimension_numbers = #tpu.dot_dimension_numbers<[1], [0], [0], [1], [0, 0, 1, 1], [], []>} : vector<128x128xbf16>, vector<128x128xbf16>, vector<128x128xf32> -> vector<128x128xf32>
    %c0_15 = arith.constant 0 : index
    %c0_16 = arith.constant 0 : index
    %32 = vector.load %arg8[%c0_15, %c0_16] : memref<1x128xf32, #tpu.memory_space<vmem>>, vector<1x128xf32>
    %33 = vector.broadcast %32 : vector<1x128xf32> to vector<128x128xf32>
    %34 = arith.addf %31, %33 : vector<128x128xf32>
    %35 = vector.broadcast %8 : vector<128x1xf32> to vector<128x128xf32>
    %36 = arith.mulf %34, %35 : vector<128x128xf32>
    %37 = arith.truncf %36 : vector<128x128xf32> to vector<128x128xbf16>
    %cst_17 = arith.constant 1.280000e+02 : f32
    %38 = math.sqrt %cst_17 : f32
    %cst_18 = arith.constant 1.000000e+00 : f32
    %39 = arith.divf %cst_18, %38 : f32
    %c0_19 = arith.constant 0 : index
    %c0_20 = arith.constant 0 : index
    %40 = vector.load %arg9[%c0_19, %c0_20] : memref<8x128xbf16, #tpu.memory_space<vmem>>, vector<8x128xbf16>
    %cst_21 = arith.constant dense<0.000000e+00> : vector<8x128xf32>
    %41 = tpu.matmul %40, %29, %cst_21 {dimension_numbers = #tpu.dot_dimension_numbers<[1], [1], [0], [0], [0, 0, 1, 0], [], []>} : vector<8x128xbf16>, vector<128x128xbf16>, vector<8x128xf32> -> vector<8x128xf32>
    %42 = vector.broadcast %39 : f32 to vector<8x128xf32>
    %43 = arith.mulf %41, %42 : vector<8x128xf32>
    %cst_22 = arith.constant dense<0xFF800000> : vector<8xf32>
    %44 = vector.multi_reduction <maximumf>, %43, %cst_22 [1] : vector<8x128xf32> to vector<8xf32>
    %45 = vector.shape_cast %44 : vector<8xf32> to vector<8x1xf32>
    %46 = vector.broadcast %45 : vector<8x1xf32> to vector<8x128xf32>
    %47 = arith.subf %43, %46 : vector<8x128xf32>
    %48 = math.exp %47 : vector<8x128xf32>
    %49 = vector.broadcast %13 : vector<1x128xf32> to vector<8x128xf32>
    %50 = arith.mulf %48, %49 : vector<8x128xf32>
    %cst_23 = arith.constant dense<0.000000e+00> : vector<8xf32>
    %51 = vector.multi_reduction <add>, %50, %cst_23 [1] : vector<8x128xf32> to vector<8xf32>
    %52 = vector.shape_cast %51 : vector<8xf32> to vector<8x1xf32>
    %cst_24 = arith.constant 9.99999968E-21 : f32
    %53 = vector.broadcast %cst_24 : f32 to vector<8x1xf32>
    %54 = arith.maximumf %52, %53 : vector<8x1xf32>
    %55 = tpu.reciprocal %54 {approx = true} : vector<8x1xf32> -> vector<8x1xf32>
    %56 = arith.truncf %50 : vector<8x128xf32> to vector<8x128xbf16>
    %cst_25 = arith.constant dense<0.000000e+00> : vector<8x128xf32>
    %57 = tpu.matmul %56, %29, %cst_25 {dimension_numbers = #tpu.dot_dimension_numbers<[1], [0], [0], [1], [0, 0, 1, 1], [], []>} : vector<8x128xbf16>, vector<128x128xbf16>, vector<8x128xf32> -> vector<8x128xf32>
    %58 = vector.broadcast %55 : vector<8x1xf32> to vector<8x128xf32>
    %59 = arith.mulf %57, %58 : vector<8x128xf32>
    %60 = arith.truncf %59 : vector<8x128xf32> to vector<8x128xbf16>
    %c0_26 = arith.constant 0 : index
    %c0_27 = arith.constant 0 : index
    %61 = vector.load %arg10[%c0_26, %c0_27] : memref<128x256xbf16, #tpu.memory_space<vmem>>, vector<128x256xbf16>
    %cst_28 = arith.constant dense<0.000000e+00> : vector<8x256xf32>
    %62 = tpu.matmul %60, %61, %cst_28 {dimension_numbers = #tpu.dot_dimension_numbers<[1], [0], [0], [1], [0, 0, 1, 1], [], []>} : vector<8x128xbf16>, vector<128x256xbf16>, vector<8x256xf32> -> vector<8x256xf32>
    %c0_29 = arith.constant 0 : index
    %c0_30 = arith.constant 0 : index
    %63 = vector.load %arg11[%c0_29, %c0_30] : memref<1x256xf32, #tpu.memory_space<vmem>>, vector<1x256xf32>
    %64 = vector.broadcast %63 : vector<1x256xf32> to vector<8x256xf32>
    %65 = arith.addf %62, %64 : vector<8x256xf32>
    %66 = vector.extract_strided_slice %65 {offsets = [0, 0], sizes = [8, 128], strides = [1, 1]} : vector<8x256xf32> to vector<8x128xf32>
    %c0_31 = arith.constant 0 : index
    %c0_32 = arith.constant 0 : index
    %c0_33 = arith.constant 0 : index
    %67 = vector.load %arg12[%c0_31, %c0_32, %c0_33] : memref<1x8x128xf32, #tpu.memory_space<vmem>>, vector<1x8x128xf32>
    %68 = vector.shape_cast %67 : vector<1x8x128xf32> to vector<8x128xf32>
    %69 = vector.shape_cast %66 : vector<8x128xf32> to vector<1x8x128xf32>
    tpu.vector_store %arg12[%c0_31, %c0_32, %c0_33], %69 {strides = array<i32>} : memref<1x8x128xf32, #tpu.memory_space<vmem>>, vector<1x8x128xf32>,
    %70 = vector.extract_strided_slice %65 {offsets = [0, 128], sizes = [8, 128], strides = [1, 1]} : vector<8x256xf32> to vector<8x128xf32>
    %71 = arith.truncf %70 : vector<8x128xf32> to vector<8x128xbf16>
    %cst_34 = arith.constant dense<0.000000e+00> : vector<8x128xf32>
    %72 = tpu.matmul %71, %37, %cst_34 {dimension_numbers = #tpu.dot_dimension_numbers<[1], [1], [0], [0], [0, 0, 1, 0], [], []>} : vector<8x128xbf16>, vector<128x128xbf16>, vector<8x128xf32> -> vector<8x128xf32>
    %73 = arith.truncf %72 : vector<8x128xf32> to vector<8x128xbf16>
    %c0_35 = arith.constant 0 : index
    %c0_36 = arith.constant 0 : index
    %c0_37 = arith.constant 0 : index
    %74 = vector.load %arg13[%c0_35, %c0_36, %c0_37] : memref<1x8x128xbf16, #tpu.memory_space<vmem>>, vector<1x8x128xbf16>
    %75 = vector.shape_cast %74 : vector<1x8x128xbf16> to vector<8x128xbf16>
    %76 = vector.shape_cast %73 : vector<8x128xbf16> to vector<1x8x128xbf16>
    tpu.vector_store %arg13[%c0_35, %c0_36, %c0_37], %76 {strides = array<i32>} : memref<1x8x128xbf16, #tpu.memory_space<vmem>>, vector<1x8x128xbf16>,
    return
  }
  func.func @transform_0(%arg0: i32, %arg1: memref<2xi32, #tpu.memory_space<smem>>) -> (i32, i32, i32) {
    %c0_i32 = arith.constant 0 : i32
    %c0_i32_0 = arith.constant 0 : i32
    %c0_i32_1 = arith.constant 0 : i32
    return %arg0, %c0_i32, %c0_i32_0 : i32, i32, i32
  }
  func.func @transform_1(%arg0: i32, %arg1: memref<2xi32, #tpu.memory_space<smem>>) -> (i32, i32) {
    %c0_i32 = arith.constant 0 : i32
    %c0_i32_0 = arith.constant 0 : i32
    %c0_i32_1 = arith.constant 0 : i32
    return %c0_i32, %c0_i32_0 : i32, i32
  }
  func.func @transform_2(%arg0: i32, %arg1: memref<2xi32, #tpu.memory_space<smem>>) -> (i32, i32) {
    %c0_i32 = arith.constant 0 : i32
    %c0_i32_0 = arith.constant 0 : i32
    %c0_i32_1 = arith.constant 0 : i32
    return %c0_i32, %c0_i32_0 : i32, i32
  }
  func.func @transform_3(%arg0: i32, %arg1: memref<2xi32, #tpu.memory_space<smem>>) -> (i32, i32) {
    %c0_i32 = arith.constant 0 : i32
    %c0_i32_0 = arith.constant 0 : i32
    %c0_i32_1 = arith.constant 0 : i32
    return %c0_i32, %c0_i32_0 : i32, i32
  }
  func.func @transform_4(%arg0: i32, %arg1: memref<2xi32, #tpu.memory_space<smem>>) -> (i32, i32) {
    %c0_i32 = arith.constant 0 : i32
    %c0_i32_0 = arith.constant 0 : i32
    %c0_i32_1 = arith.constant 0 : i32
    return %c0_i32, %c0_i32_0 : i32, i32
  }
  func.func @transform_5(%arg0: i32, %arg1: memref<2xi32, #tpu.memory_space<smem>>) -> (i32, i32) {
    %c0_i32 = arith.constant 0 : i32
    %c0_i32_0 = arith.constant 0 : i32
    %c0_i32_1 = arith.constant 0 : i32
    return %c0_i32, %c0_i32_0 : i32, i32
  }
  func.func @transform_6(%arg0: i32, %arg1: memref<2xi32, #tpu.memory_space<smem>>) -> (i32, i32) {
    %c0_i32 = arith.constant 0 : i32
    %c0_i32_0 = arith.constant 0 : i32
    %c0_i32_1 = arith.constant 0 : i32
    return %c0_i32, %c0_i32_0 : i32, i32
  }
  func.func @transform_7(%arg0: i32, %arg1: memref<2xi32, #tpu.memory_space<smem>>) -> (i32, i32) {
    %c0_i32 = arith.constant 0 : i32
    %c0_i32_0 = arith.constant 0 : i32
    %c0_i32_1 = arith.constant 0 : i32
    return %c0_i32, %c0_i32_0 : i32, i32
  }
  func.func @transform_8(%arg0: i32, %arg1: memref<2xi32, #tpu.memory_space<smem>>) -> (i32, i32) {
    %c0_i32 = arith.constant 0 : i32
    %c0_i32_0 = arith.constant 0 : i32
    %c0_i32_1 = arith.constant 0 : i32
    return %c0_i32, %c0_i32_0 : i32, i32
  }
  func.func @transform_9(%arg0: i32, %arg1: memref<2xi32, #tpu.memory_space<smem>>) -> (i32, i32) {
    %c0_i32 = arith.constant 0 : i32
    %c0_i32_0 = arith.constant 0 : i32
    %c0_i32_1 = arith.constant 0 : i32
    return %c0_i32, %c0_i32_0 : i32, i32
  }
  func.func @transform_10(%arg0: i32, %arg1: memref<2xi32, #tpu.memory_space<smem>>) -> (i32, i32, i32) {
    %c0_i32 = arith.constant 0 : i32
    %c0_i32_0 = arith.constant 0 : i32
    %c0_i32_1 = arith.constant 0 : i32
    return %arg0, %c0_i32, %c0_i32_0 : i32, i32, i32
  }
  func.func @transform_11(%arg0: i32, %arg1: memref<2xi32, #tpu.memory_space<smem>>) -> (i32, i32, i32) {
    %c0_i32 = arith.constant 0 : i32
    %c0_i32_0 = arith.constant 0 : i32
    %c0_i32_1 = arith.constant 0 : i32
    return %arg0, %c0_i32, %c0_i32_0 : i32, i32, i32
  }
}

</mosaic_0001>

<bundles_post_ra>
// kernel: tpu_custom_call.1
= control target key start
LH: loop header
LB: loop body
LE: loop exit
PB: predicated region body
PF: predicated region fallthrough
CT: control target
= control target key end

     0   :  { %s3083_s0 = inlined_call_operand.hbm [shape: s32[2], index: 0, kind: input, shape index: {}]   ;;  %s3084_s1 = inlined_call_operand.hbm [shape: bf16[2,128,128], index: 1, kind: input, shape index: {}]   ;;  %s3085_s2 = inlined_call_operand.hbm [shape: bf16[128,128], index: 2, kind: input, shape index: {}]   ;;  %s3086_s3 = inlined_call_operand.vmem [shape: f32[1,128], index: 3, kind: input, shape index: {}]   ;;  %s3087_s4 = inlined_call_operand.hbm [shape: bf16[128,128], index: 4, kind: input, shape index: {}]   ;;  %s3088_s5 = inlined_call_operand.vmem [shape: f32[1,128], index: 5, kind: input, shape index: {}]   ;;  %s3089_s6 = inlined_call_operand.hbm [shape: bf16[128,128], index: 6, kind: input, shape index: {}]   ;;  %s3090_s7 = inlined_call_operand.vmem [shape: f32[1,128], index: 7, kind: input, shape index: {}]   ;;  %s3091_s8 = inlined_call_operand.vmem [shape: bf16[8,128], index: 8, kind: input, shape index: {}]   ;;  %s3092_s9 = inlined_call_operand.hbm [shape: bf16[128,256], index: 9, kind: input, shape index: {}]   ;;  %s3093_s10 = inlined_call_operand.vmem [shape: f32[1,256], index: 10, kind: input, shape index: {}]   ;;  %s3094_s11 = inlined_call_operand.hbm [shape: f32[2,8,128], index: 11, kind: output, shape index: {0}]   ;;  %s3095_s12 = inlined_call_operand.hbm [shape: bf16[2,8,128], index: 12, kind: output, shape index: {1}]  }
   0x1   :  { %3103 = sst [smem:[#allocation24_spill]] %s3093_s10  ;;  %s2136_s23 = scalar_lea.hbm %s3083_s0, 16 }
   0x2   :  { %3104 = sst [smem:[#allocation25_spill]] %s3094_s11  ;;  %p2137_p0 = scmp.ne.s32.totalorder %s3083_s0, %s2136_s23 }
   0x3   :  { %3105 = sst [smem:[#allocation26_spill]] %s3095_s12  ;;  %p2140_p1 = scmp.lt.u32.totalorder %s2136_s23, %s3083_s0 }
   0x5   :  { %p2142_p2 = pnand %p2140_p1, %p2137_p0 }
   0x7   :  { %2145 = shalt.err (!%p2142_p2)  }
   0x8   :  { %s2398_s28 = smov [#allocation3]  }
   0x9   :  { %19 = dma.hbm_to_smem %s3083_s0, 16, %s2398_s28, [#allocation2] }
   0xa   :  { %2360 = dma.done.wait [#allocation2], 16 }
   0xb   :  { %2361 = vsyncadd [#allocation2], 4294967280 }
   0xc   :  { %21 = sfence }
   0xd   :  { %22 = vsyncpa [#allocation5], 0 }
   0xe   :  { %24 = vsyncpa [#allocation5 + $0x1], 0 }
   0xf   :  { %25 = vsyncpa [#allocation8], 0 }
  0x10   :  { %26 = vsyncpa [#allocation11], 0 }
  0x11   :  { %27 = vsyncpa [#allocation6], 0 }
  0x12   :  { %29 = vsyncpa [#allocation6 + $0x1], 0 }
  0x13   :  { %30 = vsyncpa [#allocation15], 0 }
  0x14   :  { %32 = vsyncpa [#allocation15 + $0x1], 0  ;;  %s2490_s13 = smov 0   ;;  %s2492_s14 = smov 0  }
  0x15   :  { %s2494_s15 = smov 0   ;;  %s2496_s16 = smov 0  }
  0x16 LB: > { %3106 = sst [smem:[#allocation22_spill]] %s2384_s13  ;;  %s2511_s0 = sadd.s32 4294967295, %s2396_s16   ;;  %s2396_s16 = sphi %s2496_s16, %s3133_s16   ;;  %s2392_s15 = sphi %s2494_s15, %s3132_s15   ;;  %s2388_s14 = sphi %s2492_s14, %s3131_s14   ;;  %s2384_s13 = sphi %s2490_s13, %s3130_s13  }
  0x17   : > { %s1652_s17 = sadd.s32 4294967294, %s2396_s16   ;;  %p58_p3 = scmp.ne.s32.totalorder %s2388_s14, %s2384_s13 }
  0x18   : > { %p3097_p4 = scmp.eq.s32.totalorder %s2511_s0, 0  ;;  %p277_p6 = scmp.eq.s32.totalorder %s1652_s17, 1 }
  0x19   : > { %p1653_p8 = scmp.ge.s32.totalorder %s2396_s16, 1  ;;  %p310_p10 = scmp.lt.s32.totalorder %s2396_s16, 3 }
  0x1a   : > { %p2520_p7 = por %p3097_p4, %p58_p3  ;;  %p2525_p9 = por %p277_p6, %p58_p3 }
  0x1b   : > { %p2530_p11 = pnand %p1653_p8, %p310_p10  ;;  %s2399_s21 = smov [#allocation7]  }
  0x1c   : > { %s3107_s18 = scalar_select %p2520_p7, 1, 0 }
  0x1d   : > { %s3108_s19 = scalar_select %p2525_p9, 1, 0 }
  0x1e   : > { %s3110_s20 = scalar_select %p2530_p11, 1, 0 }
  0x1f   : > { %3109 = sst [smem:[#allocation23_spill]] %s3108_s19  ;;  %s322_s22 = sshll.u32 %s2399_s21, 4  ;;  %s2534_s22 = int_to_ptr.vmem [resolvable:$true] %s322_s22 }
  0x20   : > { %p1998_p12 = pneg %p2530_p11  ;;  %s2400_s24 = smov [#allocation10]  }
  0x21   : > { %s354_s25 = sshll.u32 %s2400_s24, 4  ;;  %s2401_s26 = smov [#allocation9]   ;;  %s2545_s25 = int_to_ptr.vmem [resolvable:$true] %s354_s25 }
  0x22   : > { %p2541_p0 = pnand %p1998_p12, %p3097_p4  ;;  %s2547_s27 = sshll.u32 %s2401_s26, 4  ;;  %s339_s27 = int_to_ptr.vmem [resolvable:$true] %s2547_s27 }
  0x23   : > { %s2146_s30 = scalar_lea.hbm %s3085_s2, 1024 }
  0x24   : > { %p2147_p1 = scmp.ne.s32.totalorder %s3085_s2, %s2146_s30  ;;  %p2557_p2 = pneg %p2541_p0 }
  0x25   : > { %p2153_p8 = scmp.lt.u32.totalorder %s2146_s30, %s3085_s2 }
  0x26   : > { %p2149_p3 = pnand %p2557_p2, %p2147_p1 }
  0x28   : > { %p2150_p6 = pneg %p2149_p3 }
  0x2a   : > { %p2155_p10 = pnand %p2153_p8, %p2150_p6 }
  0x2c   : > { %2158 = shalt.err (!%p2155_p10)
}
  0x2d   : > { %s2159_s28 = scalar_lea.vmem %s2534_s22, 1024  ;;  %p2167_p5 = scmp.lt.s32.totalorder %s2534_s22, %s2534_s22 }
  0x2e   : > { %p2160_p12 = scmp.ne.s32.totalorder %s2534_s22, %s2159_s28  ;;  %p2168_p9 = scmp.lt.s32.totalorder %s2159_s28, %s2159_s28 }
  0x30   : > { %p2162_p13 = pnand %p2160_p12, %p2557_p2  ;;  %p2169_p1 = por %p2168_p9, %p2167_p5 }
  0x32   : > { %p2163_p4 = pneg %p2162_p13 }
  0x34   : > { %p2170_p3 = pnand %p2169_p1, %p2163_p4 }
  0x36   : > { %2173 = shalt.err (!%p2170_p3)
}
  0x37   : > { %s2402_s29 = smov 64   ;;  %s2403_s30 = smov 4  }
  0x38   : > { %2001 = dma.hbm_to_vmem [thread:$0]  (!%p2541_p0), %s3085_s2, 1024, %s2534_s22, [#allocation8], %s2402_s29, %s2402_s29, %s2403_s30  }
  0x39   : > { %s2174_s28 = scalar_lea.hbm %s3089_s6, 1024 }
  0x3a   : > { %p2175_p4 = scmp.ne.s32.totalorder %s3089_s6, %s2174_s28  ;;  %p2181_p13 = scmp.lt.u32.totalorder %s2174_s28, %s3089_s6 }
  0x3c   : > { %p2177_p5 = pnand %p2175_p4, %p2557_p2 }
  0x3e   : > { %p2178_p9 = pneg %p2177_p5 }
  0x40   : > { %p2183_p6 = pnand %p2181_p13, %p2178_p9 }
  0x42   : > { %2186 = shalt.err (!%p2183_p6)
}
  0x43   : > { %s2187_s22 = scalar_lea.vmem %s2545_s25, 1024  ;;  %p2195_p1 = scmp.lt.s32.totalorder %s2545_s25, %s2545_s25 }
  0x44   : > { %p2188_p8 = scmp.ne.s32.totalorder %s2545_s25, %s2187_s22  ;;  %p2196_p3 = scmp.lt.s32.totalorder %s2187_s22, %s2187_s22 }
  0x46   : > { %p2190_p10 = pnand %p2188_p8, %p2557_p2  ;;  %p2197_p4 = por %p2196_p3, %p2195_p1 }
  0x48   : > { %p2191_p12 = pneg %p2190_p10 }
  0x4a   : > { %p2198_p5 = pnand %p2197_p4, %p2191_p12 }
  0x4c   : > { %2201 = shalt.err (!%p2198_p5)
}
  0x4d   : > { %2007 = dma.hbm_to_vmem [thread:$0]  (!%p2541_p0), %s3089_s6, 1024, %s2545_s25, [#allocation11], %s2402_s29, %s2402_s29, %s2403_s30  }
  0x4e   : > { %s2202_s17 = scalar_lea.hbm %s3087_s4, 1024 }
  0x4f   : > { %p2203_p9 = scmp.ne.s32.totalorder %s3087_s4, %s2202_s17  ;;  %p2209_p8 = scmp.lt.u32.totalorder %s2202_s17, %s3087_s4 }
  0x51   : > { %p2205_p13 = pnand %p2203_p9, %p2557_p2 }
  0x53   : > { %p2206_p6 = pneg %p2205_p13 }
  0x55   : > { %p2211_p10 = pnand %p2209_p8, %p2206_p6 }
  0x57   : > { %2214 = shalt.err (!%p2211_p10)
}
  0x58   : > { %s2215_s22 = scalar_lea.vmem %s339_s27, 1024  ;;  %p2223_p4 = scmp.lt.s32.totalorder %s339_s27, %s339_s27 }
  0x59   : > { %p2216_p12 = scmp.ne.s32.totalorder %s339_s27, %s2215_s22  ;;  %p2224_p5 = scmp.lt.s32.totalorder %s2215_s22, %s2215_s22 }
  0x5b   : > { %p2218_p1 = pnand %p2216_p12, %p2557_p2  ;;  %p2225_p7 = por %p2224_p5, %p2223_p4 }
  0x5d   : > { %p2219_p3 = pneg %p2218_p1 }
  0x5f   : > { %p2226_p11 = pnand %p2225_p7, %p2219_p3 }
  0x61   : > { %2229 = shalt.err (!%p2226_p11)
}
  0x62   : > { %2004 = dma.hbm_to_vmem [thread:$0]  (!%p2541_p0), %s3087_s4, 1024, %s339_s27, [#allocation8], %s2402_s29, %s2402_s29, %s2403_s30  }
  0x63   : > { %s2404_s11 = smov [#allocation12]   ;;  %s2230_s21 = scalar_lea.hbm %s3092_s9, 2048 }
  0x64   : > { %s373_s12 = sshll.u32 %s2404_s11, 4  ;;  %p2231_p7 = scmp.ne.s32.totalorder %s3092_s9, %s2230_s21  ;;  %s374_s12 = int_to_ptr.vmem [resolvable:$true] %s373_s12 }
  0x65   : > { %p2237_p13 = scmp.lt.u32.totalorder %s2230_s21, %s3092_s9 }
  0x66   : > { %p2233_p11 = pnand %p2231_p7, %p2557_p2 }
  0x68   : > { %p2234_p9 = pneg %p2233_p11 }
  0x6a   : > { %p2239_p6 = pnand %p2237_p13, %p2234_p9 }
  0x6c   : > { %2242 = shalt.err (!%p2239_p6)
}
  0x6d   : > { %s2243_s27 = scalar_lea.vmem %s374_s12, 2048  ;;  %p2251_p1 = scmp.lt.s32.totalorder %s374_s12, %s374_s12 }
  0x6e   : > { %p2244_p8 = scmp.ne.s32.totalorder %s374_s12, %s2243_s27  ;;  %p2252_p3 = scmp.lt.s32.totalorder %s2243_s27, %s2243_s27 }
  0x70   : > { %p2246_p10 = pnand %p2244_p8, %p2557_p2  ;;  %p2253_p4 = por %p2252_p3, %p2251_p1 }
  0x72   : > { %p2247_p12 = pneg %p2246_p10 }
  0x74   : > { %p2254_p5 = pnand %p2253_p4, %p2247_p12 }
  0x76   : > { %2257 = shalt.err (!%p2254_p5)
}
  0x77   : > { %s2405_s25 = smov 128   ;;  %s2406_s19 = smov 8  }
  0x78   : > { %2010 = dma.hbm_to_vmem [thread:$0]  (!%p2541_p0), %s3092_s9, 2048, %s374_s12, [#allocation11], %s2405_s25, %s2405_s25, %s2406_s19  }
  0x79   : > { %s2648_s13 = sadd.s32 1, %s2396_s16   ;;  %s45_s21 = sadd.s32 1, %s2392_s15 }
  0x7a   : > { %s42_s17 = ssub.s32 %s2396_s16, %s2648_s13  ;;  %p52_p7 = scmp.ne.s32.totalorder %s2392_s15, %s2388_s14 }
  0x7b   : > { %p43_p2 = scmp.eq.s32.totalorder %s42_s17, 0  ;;  %p53_p11 = scmp.eq.s32.totalorder %s2396_s16, 0 }
  0x7c   : > { %p3113_p13 = scmp.eq.s32.totalorder %s2511_s0, 1  ;;  %p2026_p8 = scmp.lt.s32.totalorder %s2396_s16, 2 }
  0x7d   : > { %s2657_s24 = scalar_select %p43_p2, %s2392_s15, %s45_s21  }
  0x7e   : > { %p54_p9 = por %p53_p11, %p52_p7  ;;  %p2661_p6 = por %p3113_p13, %p52_p7 }
  0x7f   : > { %s390_s23 = sand.u32 1, %s2392_s15   ;;  %s1744_s12 = sshll.u32 %s2396_s16, 10 }
  0x80   : > { %s1659_s28 = sshll.u32 %s390_s23, 6  ;;  %s2671_s25 = scalar_lea.hbm %s3084_s1, %s1744_s12 }
  0x81   : > { %s394_s19 = scalar_lea.vmem [#allocation4], %s1659_s28  ;;  %p2675_p0 = pnand %p2026_p8, %p54_p9 }
  0x82   : > { %s401_s10 = sshll.u32 %s394_s19, 4  ;;  %s2679_s17 = scalar_lea.sflag [#allocation5], %s390_s23  ;;  %s2673_s10 = int_to_ptr.vmem [resolvable:$true] %s401_s10 }
  0x83   : > { %s2258_s21 = scalar_lea.hbm %s2671_s25, 1024  ;;  %p2260_p12 = pneg %p2675_p0 }
  0x84   : > { %p2259_p10 = scmp.ne.s32.totalorder %s2671_s25, %s2258_s21  ;;  %s2263_s22 = scalar_lea.hbm %s3084_s1, 2048 }
  0x85   : > { %p2264_p4 = scmp.lt.u32.totalorder %s2671_s25, %s3084_s1  ;;  %p2265_p5 = scmp.lt.u32.totalorder %s2263_s22, %s2258_s21 }
  0x86   : > { %p2261_p1 = pnand %p2260_p12, %p2259_p10  ;;  %p2267_p7 = scmp.lt.u32.totalorder %s2258_s21, %s2671_s25 }
  0x87   : > { %p2266_p2 = por %p2265_p5, %p2264_p4 }
  0x88   : > { %p2262_p3 = pneg %p2261_p1 }
  0x89   : > { %p2268_p11 = por %p2267_p7, %p2266_p2 }
  0x8b   : > { %p2269_p9 = pnand %p2268_p11, %p2262_p3 }
  0x8d   : > { %2272 = shalt.err (!%p2269_p9)
}
  0x8e   : > { %s2273_s23 = scalar_lea.vmem %s2673_s10, 1024  ;;  %s2407_s28 = smov [#allocation4]  }
  0x8f   : > { %p2274_p13 = scmp.ne.s32.totalorder %s2673_s10, %s2273_s23  ;;  %s2278_s12 = sshll.u32 %s2407_s28, 4  ;;  %s2279_s12 = int_to_ptr.vmem [resolvable:$false] %s2278_s12 }
  0x90   : > { %s2280_s27 = scalar_lea.vmem %s2279_s12, 2048  ;;  %p2281_p1 = scmp.lt.s32.totalorder %s2673_s10, %s2279_s12 }
  0x91   : > { %p2276_p8 = pnand %p2274_p13, %p2260_p12  ;;  %p2282_p4 = scmp.lt.s32.totalorder %s2280_s27, %s2273_s23 }
  0x93   : > { %p2277_p10 = pneg %p2276_p8  ;;  %p2283_p5 = por %p2282_p4, %p2281_p1 }
  0x95   : > { %p2284_p2 = pnand %p2283_p5, %p2277_p10 }
  0x97   : > { %2287 = shalt.err (!%p2284_p2)
}
  0x98   : > { %2014 = dma.hbm_to_vmem [thread:$0]  (!%p2675_p0), %s2671_s25, 1024, %s2673_s10, %s2679_s17, %s2402_s29, %s2402_s29, %s2403_s30  }
  0x99   : > { %p3116_p12 = scmp.ne.s32.totalorder %s3110_s20, 0 }
  0x9a   : > { %s2713_s21 = sand.u32 (!%p3116_p12), 1, %s2388_s14   ;;  %p3117_p3 = scmp.ne.s32.totalorder (!%p3116_p12), %s3107_s18, 0 }
  0x9b   : > { %413 = sbr.rel (%p3116_p12) target bundleno = 1744 (0x6d0), region = 60  ;;  %s1663_s22 = sshll.u32 (!%p3116_p12), %s2713_s21, 6 }
  0x9c   : > { %s416_s19 = scalar_lea.sflag (!%p3116_p12), [#allocation5], %s2713_s21  ;;  %s2717_s23 = scalar_lea.vmem (!%p3116_p12), [#allocation4], %s1663_s22 }
  0xa2   : > { %2363 = dma.done.wait (%p3117_p3), %s416_s19, 1024  }
  0xa3   : > { %2365 = vsyncadd (%p3117_p3), %s416_s19, 4294966272  ;;  %p3118_p0 = scmp.eq.s32.totalorder %s2511_s0, 0 }
  0xa5   : > { %2367 = dma.done.wait (%p3118_p0), [#allocation8], 2048   ;;  %p3119_p7 = pmov %p3118_p0 }
  0xa6   : > { %p3120_p11 = pmov %p3118_p0 }
  0xa7   : > { %2369 = vsyncadd (%p3119_p7), [#allocation8], 4294965248 }
  0xa8   : > { %2371 = dma.done.wait (%p3120_p11), [#allocation11], 3072   ;;  %p3121_p9 = pmov %p3118_p0 }
  0xa9   : > { %v2076_v0 = vld [vmem:[#allocation7] sm:$0xff]   ;;  %v2077_v1 = vld [vmem:[#allocation7 + $0x8] sm:$0xff]   ;;  %v2078_v2 = vld [vmem:[#allocation7 + $0x10] sm:$0xff]   ;;  %v2408_v32 = vmov 0.0   ;;  %v497_v33 = vlaneseq  ;;  %s480_s18 = sld [smem:[#allocation3 + %s2511_s0]]  ;;  %s1668_s19 = sshll.u32 %s2713_s21, 3 }
  0xaa   : > { %2373 = vsyncadd (%p3121_p9), [#allocation11], 4294964224  ;;  %1820 = vmatprep.subr.bf16.mxu0 %v2076_v0  ;;  %v2079_v3 = vld [vmem:[#allocation7 + $0x18] sm:$0xff]   ;;  %v2084_v4 = vld [vmem:[%s2717_s23] sm:$0xff]   ;;  %s3122_s22 = sld [smem:[#allocation24_spill]]  ;;  %s3123_s25 = sld [smem:[#allocation25_spill]] }
  0xab   : > { %1821 = vmatpush3.bf16.msra.mxu0 %v2076_v0  ;;  %1836 = vmatprep.mubr.bf16.mxu0 %v2084_v4  ;;  %v2080_v5 = vld [vmem:[#allocation7 + $0x20] sm:$0xff]   ;;  %v2081_v6 = vld [vmem:[#allocation7 + $0x28] sm:$0xff]   ;;  %v2082_v9 = vld [vmem:[#allocation7 + $0x30] sm:$0xff]   ;;  %v2743_v34 = vshrl.u32 %v497_v33, 7  ;;  %s1481_s11 = scalar_lea.sflag [#allocation6], %s2713_s21  ;;  %s2411_s28 = smov [#allocation13]  }
  0xac   : > { %1822 = vmatprep.subr.bf16.mxu0 %v2077_v1  ;;  %v2092_v7 = vld [vmem:[#allocation9] sm:$0xff]   ;;  %v2094_v8 = vld [vmem:[#allocation9 + $0x8] sm:$0xff]   ;;  %v2096_v10 = vld [vmem:[#allocation9 + $0x10] sm:$0xff]   ;;  %s2292_s12 = sshll.u32 %s2411_s28, 4  ;;  %s2293_s12 = int_to_ptr.vmem [resolvable:$false] %s2292_s12 }
  0xad   : > { %1852 = vmatprep.subr.bf16.mxu1 %v2092_v7  ;;  %v2083_v11 = vld [vmem:[#allocation7 + $0x38] sm:$0xff]   ;;  %v2093_v13 = vld [vmem:[#allocation10] sm:$0xff]   ;;  %v2085_v15 = vld [vmem:[%s2717_s23 + $0x8] sm:$0xff]   ;;  %v500_v35 = vadd.s32 16, %v2743_v34  ;;  %v501_v37 = vadd.s32 24, %v2743_v34  ;;  %v499_v39 = vadd.s32 8, %v2743_v34 }
  0xae   : > { %1853 = vmatpush3.bf16.msra.mxu1 %v2092_v7  ;;  %v2098_v12 = vld [vmem:[#allocation9 + $0x18] sm:$0xff]   ;;  %v2100_v14 = vld [vmem:[#allocation9 + $0x20] sm:$0xff]   ;;  %v2086_v16 = vld [vmem:[%s2717_s23 + $0x10] sm:$0xff]   ;;  %v504_v49 = vadd.s32 48, %v2743_v34  ;;  %v502_v53 = vadd.s32 32, %v2743_v34  ;;  %v505_v57 = vadd.s32 56, %v2743_v34 }
  0xaf   : > { %1823 = vmatpush3.bf16.msra.mxu0 %v2077_v1  ;;  %1854 = vmatprep.subr.bf16.mxu1 %v2094_v8  ;;  %v2095_v17 = vld [vmem:[#allocation10 + $0x8] sm:$0xff]   ;;  %v2097_v18 = vld [vmem:[#allocation10 + $0x10] sm:$0xff]   ;;  %v2087_v19 = vld [vmem:[%s2717_s23 + $0x18] sm:$0xff]   ;;  %v2746_v36 = vstv %s480_s18  ;;  %v503_v59 = vadd.s32 40, %v2743_v34  ;;  %s1740_s18 = sshll.u32 %s2511_s0, 7  ;;  %s2294_s27 = scalar_lea.vmem %s2293_s12, 256 }
  0xb0   : > { %1824 = vmatprep.subr.bf16.mxu0 %v2078_v2  ;;  %v2088_v20 = vld [vmem:[%s2717_s23 + $0x20] sm:$0xff]   ;;  %v2099_v21 = vld [vmem:[#allocation10 + $0x18] sm:$0xff]   ;;  %v2089_v23 = vld [vmem:[%s2717_s23 + $0x28] sm:$0xff]   ;;  %vm517_vm0 = vcmp.lt.s32.totalorder %v500_v35, %v2746_v36  ;;  %vm518_vm1 = vcmp.lt.s32.totalorder %v501_v37, %v2746_v36  ;;  %vm515_vm2 = vcmp.lt.s32.totalorder %v2743_v34, %v2746_v36  ;;  %vm516_vm3 = vcmp.lt.s32.totalorder %v499_v39, %v2746_v36  ;;  %s3014_s10 = scalar_lea.hbm %s3123_s25, %s1740_s18 }
  0xb1   : > { %v2101_v22 = vld [vmem:[#allocation10 + $0x20] sm:$0xff]   ;;  %v2090_v24 = vld [vmem:[%s2717_s23 + $0x30] sm:$0xff]   ;;  %v2091_v25 = vld [vmem:[%s2717_s23 + $0x38] sm:$0xff]   ;;  %v2763_v45 = vsel %vm517_vm0, 1.0, %v2408_v32  ;;  %v2768_v51 = vsel %vm518_vm1, 1.0, %v2408_v32  ;;  %v2773_v54 = vsel %vm515_vm2, 1.0, %v2408_v32  ;;  %vm521_vm4 = vcmp.lt.s32.totalorder %v504_v49, %v2746_v36 }
  0xb2   : > { %1855 = vmatpush3.bf16.msra.mxu1 %v2094_v8  ;;  %v2102_v26 = vld [vmem:[#allocation9 + $0x28] sm:$0xff]   ;;  %v2104_v28 = vld [vmem:[#allocation9 + $0x30] sm:$0xff]   ;;  %v2106_v30 = vld [vmem:[#allocation9 + $0x38] sm:$0xff]   ;;  %v2776_v56 = vsel %vm516_vm3, 1.0, %v2408_v32  ;;  %vm519_vm5 = vcmp.lt.s32.totalorder %v502_v53, %v2746_v36  ;;  %vm522_vm6 = vcmp.lt.s32.totalorder %v505_v57, %v2746_v36  ;;  %v2789_v4 = vsel %vm521_vm4, 1.0, %v2408_v32  ;;  %s471_s23 = scalar_lea.vmem [#allocation13], %s1668_s19 }
  0xb3   : > { %1825 = vmatpush3.bf16.msra.mxu0 %v2078_v2  ;;  %1856 = vmatprep.subr.bf16.mxu1 %v2096_v10  ;;  %v2103_v27 = vld [vmem:[#allocation10 + $0x28] sm:$0xff]   ;;  %v2105_v29 = vld [vmem:[#allocation10 + $0x30] sm:$0xff]   ;;  %v2107_v31 = vld [vmem:[#allocation10 + $0x38] sm:$0xff]   ;;  %vm520_vm7 = vcmp.lt.s32.totalorder %v503_v59, %v2746_v36  ;;  %v513_v53 = vadd.s32 120, %v2743_v34  ;;  %vm2409_vm0 = vmmov 0   ;;  %s1499_s20 = sshll.u32 %s471_s23, 4  ;;  %s1500_s20 = int_to_ptr.vmem [resolvable:$true] %s1499_s20 }
  0xb4   : > { %1826 = vmatprep.subr.bf16.mxu0 %v2079_v3  ;;  %v2752_v38 = vld [vmem:[%s3086_s3] ss:$0 sm:$0xff]  ;;  %s2288_s17 = scalar_lea.vmem %s1500_s20, 128  ;;  %p2295_p1 = scmp.lt.s32.totalorder %s1500_s20, %s2293_s12 }
  0xb5   : > { %vm530_vm14 = vcmp.lt.s32.totalorder %v513_v53, %v2746_v36  ;;  %p2289_p13 = scmp.ne.s32.totalorder %s1500_s20, %s2288_s17  ;;  %p2296_p4 = scmp.lt.s32.totalorder %s2294_s27, %s2288_s17 }
  0xb6   : > { %1857 = vmatpush3.bf16.msra.mxu1 %v2096_v10 }
  0xb7   : > { %1827 = vmatpush3.bf16.msra.mxu0 %v2079_v3  ;;  %1858 = vmatprep.subr.bf16.mxu1 %v2098_v12  ;;  %p2290_p8 = pnand %p2289_p13, %p2661_p6  ;;  %p2297_p5 = por %p2296_p4, %p2295_p1 }
  0xb8   : > { %1828 = vmatprep.subr.bf16.mxu0 %v2080_v5 }
  0xb9   : > { %p2291_p10 = pneg %p2290_p8 }
  0xba   : > { %1859 = vmatpush3.bf16.msra.mxu1 %v2098_v12  ;;  %v508_v12 = vadd.s32 80, %v2743_v34 }
  0xbb   : > { %1829 = vmatpush3.bf16.msra.mxu0 %v2080_v5  ;;  %1860 = vmatprep.subr.bf16.mxu1 %v2100_v14  ;;  %p2298_p2 = pnand %p2297_p5, %p2291_p10 }
  0xbc   : > { %1830 = vmatprep.subr.bf16.mxu0 %v2081_v6  ;;  %vm525_vm8 = vcmp.lt.s32.totalorder %v508_v12, %v2746_v36  ;;  %v2856_v12 = vsel %vm530_vm14, 1.0, %v2408_v32 }
  0xbe   : > { %1861 = vmatpush3.bf16.msra.mxu1 %v2100_v14  ;;  %v2799_v14 = vsel %vm522_vm6, 1.0, %v2408_v32 }
  0xbf   : > { %1831 = vmatpush3.bf16.msra.mxu0 %v2081_v6  ;;  %1862 = vmatprep.subr.bf16.mxu1 %v2102_v26 }
  0xc0   : > { %1832 = vmatprep.subr.bf16.mxu0 %v2082_v9 }
  0xc2   : > { %1863 = vmatpush3.bf16.msra.mxu1 %v2102_v26 }
  0xc3   : > { %1833 = vmatpush3.bf16.msra.mxu0 %v2082_v9  ;;  %1864 = vmatprep.subr.bf16.mxu1 %v2104_v28  ;;  %v2794_v9 = vsel %vm519_vm5, 1.0, %v2408_v32 }
  0xc4   : > { %1834 = vmatprep.subr.bf16.mxu0 %v2083_v11 }
  0xc6   : > { %1865 = vmatpush3.bf16.msra.mxu1 %v2104_v28 }
  0xc7   : > { %1835 = vmatpush3.bf16.msra.mxu0 %v2083_v11  ;;  %1866 = vmatprep.subr.bf16.mxu1 %v2106_v30 }
  0xc8   : > { %1884 = vmatprep.subr.bf16.mxu0 %v2093_v13 }
  0xca   : > { %1837 = vmatmul.mubr.bf16.vlgmr.msra.gmra.mrb[0].mxu0 %v2085_v15  ;;  %1867 = vmatpush3.bf16.msra.mxu1 %v2106_v30 }
  0xcb   : > { %1840 = vmatprep.mubr.bf16.mxu0 %v2086_v16  ;;  %1885 = vmatpush3.bf16.msra.mxu0 %v2093_v13  ;;  %v506_v16 = vadd.s32 64, %v2743_v34 }
  0xcc   : > { %1886 = vmatprep.subr.bf16.mxu0 %v2095_v17  ;;  %1916 = vmatprep.subr.bf16.mxu1 %v2408_v32 }
  0xcd   : > { %vm523_vm9 = vcmp.lt.s32.totalorder %v506_v16, %v2746_v36 }
  0xcf   : > { %1887 = vmatpush3.bf16.msra.mxu0 %v2095_v17 }
  0xd0   : > { %1888 = vmatprep.subr.bf16.mxu0 %v2097_v18 }
  0xd2   : > { %1841 = vmatmul.mubr.bf16.gmra.mrb[4].mxu0 %v2087_v19  ;;  %v2805_v19 = vsel %vm520_vm7, 1.0, %v2408_v32 }
  0xd3   : > { %1844 = vmatprep.mubr.bf16.mxu0 %v2088_v20  ;;  %1889 = vmatpush3.bf16.msra.mxu0 %v2097_v18  ;;  %v509_v20 = vadd.s32 88, %v2743_v34 }
  0xd4   : > { %1890 = vmatprep.subr.bf16.mxu0 %v2099_v21 }
  0xd5   : > { %vm526_vm10 = vcmp.lt.s32.totalorder %v509_v20, %v2746_v36 }
  0xd7   : > { %1891 = vmatpush3.bf16.msra.mxu0 %v2099_v21 }
  0xd8   : > { %1892 = vmatprep.subr.bf16.mxu0 %v2101_v22 }
  0xda   : > { %1845 = vmatmul.mubr.bf16.gmra.mrb[8].mxu0 %v2089_v23  ;;  %v507_v23 = vadd.s32 72, %v2743_v34 }
  0xdb   : > { %1848 = vmatprep.mubr.bf16.mxu0 %v2090_v24  ;;  %1893 = vmatpush3.bf16.msra.mxu0 %v2101_v22 }
  0xdc   : > { %1894 = vmatprep.subr.bf16.mxu0 %v2103_v27  ;;  %vm524_vm11 = vcmp.lt.s32.totalorder %v507_v23, %v2746_v36 }
  0xdf   : > { %1895 = vmatpush3.bf16.msra.mxu0 %v2103_v27 }
  0xe0   : > { %1896 = vmatprep.subr.bf16.mxu0 %v2105_v29 }
  0xe2   : > { %1849 = vmatmul.mubr.bf16.gmra.mrb[12].mxu0 %v2091_v25 }
  0xe3   : > { %1897 = vmatpush3.bf16.msra.mxu0 %v2105_v29 }
  0xe4   : > { %1898 = vmatprep.subr.bf16.mxu0 %v2107_v31 }
  0xe7   : > { %1899 = vmatpush3.bf16.msra.mxu0 %v2107_v31  ;;  %v2817_v31 = vsel %vm525_vm8, 1.0, %v2408_v32 }
  0xe8   : > { %1936 = vmatprep.subr.bf16.mxu0 %v2408_v32 }
 0x19d   : > { %v1838_v40 = vpop.f32.mrb[0].mxu0 }
 0x19e   : > { %v730_v41 = vadd.f32 %v1838_v40, %v2752_v38  ;;  %v721_v42 = vpop.f32.mrb[1].mxu0  ;;  %v2822_v40 = vsel %vm523_vm9, 1.0, %v2408_v32 }
 0x19f   : > { %v722_v43 = vadd.f32 %v2752_v38, %v721_v42  ;;  %v1839_v44 = vpop.f32.mrb[2].mxu0 }
 0x1a0   : > { %v786_v46 = vmax.f32 %v730_v41, 0.0  ;;  %v733_v47 = vadd.f32 %v1839_v44, %v2752_v38  ;;  %v724_v48 = vpop.f32.mrb[3].mxu0 }
 0x1a1   : > { %v784_v50 = vmax.f32 %v722_v43, 0.0  ;;  %v725_v52 = vadd.f32 %v2752_v38, %v724_v48  ;;  %v512_v43 = vadd.s32 112, %v2743_v34  ;;  %v510_v48 = vadd.s32 96, %v2743_v34 }
 0x1a2   : > { %v787_v55 = vmax.f32 %v733_v47, 0.0  ;;  %v802_v60 = vmul.f32 %v2763_v45, %v786_v46  ;;  %v2827_v46 = vsel %vm526_vm10, 1.0, %v2408_v32 }
 0x1a3   : > { %v785_v58 = vmax.f32 %v725_v52, 0.0  ;;  %v800_v62 = vmul.f32 %v2773_v54, %v784_v50  ;;  %v2835_v52 = vsel %vm524_vm11, 1.0, %v2408_v32  ;;  %vm529_vm12 = vcmp.lt.s32.totalorder %v512_v43, %v2746_v36 }
 0x1a4   : > { %v803_v61 = vmul.f32 %v2768_v51, %v787_v55  ;;  %vm527_vm13 = vcmp.lt.s32.totalorder %v510_v48, %v2746_v36 }
 0x1a5   : > { %v801_v63 = vmul.f32 %v2776_v56, %v785_v58  ;;  %v1842_v0 = vpop.f32.mrb[4].mxu0  ;;  %v511_v58 = vadd.s32 104, %v2743_v34 }
 0x1a6   : > { %v746_v1 = vadd.f32 %v1842_v0, %v2752_v38  ;;  %v737_v2 = vpop.f32.mrb[5].mxu0  ;;  %v817_v3 = vpack.c.bf16 %v803_v61, %v802_v60 }
 0x1a7   : > { %v738_v5 = vadd.f32 %v2752_v38, %v737_v2  ;;  %v1843_v6 = vpop.f32.mrb[6].mxu0  ;;  %v816_v7 = vpack.c.bf16 %v801_v63, %v800_v62  ;;  %v2847_v2 = vsel %vm529_vm12, 1.0, %v2408_v32  ;;  %vm528_vm15 = vcmp.lt.s32.totalorder %v511_v58, %v2746_v36 }
 0x1a8   : > { %v790_v8 = vmax.f32 %v746_v1, 0.0  ;;  %v749_v10 = vadd.f32 %v1843_v6, %v2752_v38  ;;  %v740_v11 = vpop.f32.mrb[7].mxu0 }
 0x1a9   : > { %v788_v13 = vmax.f32 %v738_v5, 0.0  ;;  %v741_v15 = vadd.f32 %v2752_v38, %v740_v11  ;;  %1868 = vmatprep.mubr.bf16.mxu1 %v816_v7  ;;  %1900 = vmatprep.mubr.bf16.mxu0 %v816_v7  ;;  %v2852_v7 = vsel %vm527_vm13, 1.0, %v2408_v32 }
 0x1aa   : > { %v806_v17 = vmul.f32 %v2789_v4, %v790_v8  ;;  %v791_v18 = vmax.f32 %v749_v10, 0.0  ;;  %1869 = vmatmul.mubr.bf16.vlgmr.msra.gmra.mrb[0].mxu1 %v817_v3  ;;  %1901 = vmatmul.mubr.bf16.vlgmr.msra.gmra.mrb[16].mxu0 %v817_v3 }
 0x1ab   : > { %v804_v21 = vmul.f32 %v2794_v9, %v788_v13  ;;  %v789_v22 = vmax.f32 %v741_v15, 0.0 }
 0x1ac   : > { %v807_v24 = vmul.f32 %v2799_v14, %v791_v18 }
 0x1ad   : > { %v805_v25 = vmul.f32 %v2805_v19, %v789_v22  ;;  %v1846_v26 = vpop.f32.mrb[8].mxu0 }
 0x1ae   : > { %v762_v27 = vadd.f32 %v1846_v26, %v2752_v38  ;;  %v819_v28 = vpack.c.bf16 %v807_v24, %v806_v17  ;;  %v753_v29 = vpop.f32.mrb[9].mxu0  ;;  %v2861_v17 = vsel %vm528_vm15, 1.0, %v2408_v32  ;;  %v2878_v26 = vld [vmem:[%s3088_s5] ss:$0 sm:$0xff] }
 0x1af   : > { %v818_v30 = vpack.c.bf16 %v805_v25, %v804_v21  ;;  %v754_v35 = vadd.f32 %v2752_v38, %v753_v29  ;;  %v1847_v37 = vpop.f32.mrb[10].mxu0 }
 0x1b0   : > { %v794_v39 = vmax.f32 %v762_v27, 0.0  ;;  %v765_v41 = vadd.f32 %v1847_v37, %v2752_v38  ;;  %v756_v42 = vpop.f32.mrb[11].mxu0 }
 0x1b1   : > { %1872 = vmatprep.mubr.bf16.mxu1 %v818_v30  ;;  %1904 = vmatprep.mubr.bf16.mxu0 %v818_v30  ;;  %v792_v44 = vmax.f32 %v754_v35, 0.0  ;;  %v757_v47 = vadd.f32 %v2752_v38, %v756_v42 }
 0x1b2   : > { %v810_v49 = vmul.f32 %v2817_v31, %v794_v39  ;;  %1873 = vmatmul.mubr.bf16.gmra.mrb[4].mxu1 %v819_v28  ;;  %1905 = vmatmul.mubr.bf16.gmra.mrb[20].mxu0 %v819_v28  ;;  %v795_v50 = vmax.f32 %v765_v41, 0.0 }
 0x1b3   : > { %v808_v55 = vmul.f32 %v2822_v40, %v792_v44  ;;  %v793_v57 = vmax.f32 %v757_v47, 0.0 }
 0x1b4   : > { %v811_v59 = vmul.f32 %v2827_v46, %v795_v50 }
 0x1b5   : > { %v809_v60 = vmul.f32 %v2835_v52, %v793_v57  ;;  %v1850_v61 = vpop.f32.mrb[12].mxu0 }
 0x1b6   : > { %v821_v62 = vpack.c.bf16 %v811_v59, %v810_v49  ;;  %v778_v63 = vadd.f32 %v1850_v61, %v2752_v38  ;;  %v769_v0 = vpop.f32.mrb[13].mxu0 }
 0x1b7   : > { %v820_v1 = vpack.c.bf16 %v809_v60, %v808_v55  ;;  %v770_v3 = vadd.f32 %v2752_v38, %v769_v0  ;;  %v1851_v5 = vpop.f32.mrb[14].mxu0 }
 0x1b8   : > { %v798_v6 = vmax.f32 %v778_v63, 0.0  ;;  %v781_v8 = vadd.f32 %v1851_v5, %v2752_v38  ;;  %v772_v10 = vpop.f32.mrb[15].mxu0 }
 0x1b9   : > { %1876 = vmatprep.mubr.bf16.mxu1 %v820_v1  ;;  %1908 = vmatprep.mubr.bf16.mxu0 %v820_v1  ;;  %v796_v11 = vmax.f32 %v770_v3, 0.0  ;;  %v773_v13 = vadd.f32 %v2752_v38, %v772_v10  ;;  %v2873_v38 = vld [vmem:[%s3090_s7] ss:$0 sm:$0xff] }
 0x1ba   : > { %1877 = vmatmul.mubr.bf16.gmra.mrb[8].mxu1 %v821_v62  ;;  %v814_v15 = vmul.f32 %v2847_v2, %v798_v6  ;;  %1909 = vmatmul.mubr.bf16.gmra.mrb[24].mxu0 %v821_v62  ;;  %v799_v16 = vmax.f32 %v781_v8, 0.0 }
 0x1bb   : > { %v812_v18 = vmul.f32 %v2852_v7, %v796_v11  ;;  %v797_v20 = vmax.f32 %v773_v13, 0.0 }
 0x1bc   : > { %v815_v21 = vmul.f32 %v2856_v12, %v799_v16 }
 0x1bd   : > { %v813_v22 = vmul.f32 %v2861_v17, %v797_v20 }
 0x1be   : > { %v823_v23 = vpack.c.bf16 %v815_v21, %v814_v15 }
 0x1bf   : > { %v822_v24 = vpack.c.bf16 %v813_v22, %v812_v18 }
 0x1c1   : > { %1880 = vmatprep.mubr.bf16.mxu1 %v822_v24  ;;  %1912 = vmatprep.mubr.bf16.mxu0 %v822_v24 }
 0x1c2   : > { %1881 = vmatmul.mubr.bf16.gmra.mrb[12].mxu1 %v823_v23  ;;  %1913 = vmatmul.mubr.bf16.gmra.mrb[28].mxu0 %v823_v23 }
 0x1c3   : > { %1932 = vmatprep.mubr.msk.bf16.mxu1 %vm2409_vm0, %v2408_v32  ;;  %1952 = vmatprep.mubr.msk.bf16.mxu0 %vm2409_vm0, %v2408_v32 }
 0x27d   : > { %v1870_v25 = vpop.f32.mrb[0].mxu1  ;;  %v1902_v27 = vpop.f32.mrb[16].mxu0 }
 0x27e   : > { %v1114_v28 = vadd.f32 %v1902_v27, %v2873_v38  ;;  %v929_v29 = vpop.f32.mrb[1].mxu1  ;;  %v1105_v30 = vpop.f32.mrb[17].mxu0  ;;  %v938_v41 = vadd.f32 %v1870_v25, %v2878_v26 }
 0x27f   : > { %v1106_v35 = vadd.f32 %v2873_v38, %v1105_v30  ;;  %v1871_v37 = vpop.f32.mrb[2].mxu1  ;;  %v1903_v39 = vpop.f32.mrb[18].mxu0  ;;  %v930_v48 = vadd.f32 %v2878_v26, %v929_v29 }
 0x280   : > { %v941_v42 = vadd.f32 %v1871_v37, %v2878_v26  ;;  %v1117_v43 = vadd.f32 %v1903_v39, %v2873_v38  ;;  %v932_v44 = vpop.f32.mrb[3].mxu1  ;;  %v1108_v47 = vpop.f32.mrb[19].mxu0  ;;  %v2889_v53 = vmul.f32 %v2763_v45, %v1114_v28 }
 0x281   : > { %v933_v49 = vadd.f32 %v2878_v26, %v932_v44  ;;  %v1109_v50 = vadd.f32 %v2873_v38, %v1108_v47  ;;  %v2895_v58 = vmul.f32 %v2773_v54, %v1106_v35 }
 0x282   : > { %v993_v55 = vpack.c.bf16 %v941_v42, %v938_v41  ;;  %v2892_v57 = vmul.f32 %v2768_v51, %v1117_v43 }
 0x283   : > { %v992_v59 = vpack.c.bf16 %v933_v49, %v930_v48  ;;  %v2898_v60 = vmul.f32 %v2776_v56, %v1109_v50 }
 0x284   : > { %v1185_v61 = vpack.c.bf16 %v2892_v57, %v2889_v53 }
 0x285   : > { %v1184_v62 = vpack.c.bf16 %v2898_v60, %v2895_v58  ;;  %v1874_v63 = vpop.f32.mrb[4].mxu1  ;;  %1917 = vmatpush3.bf16.xpose.msra.mxu1 %v992_v59  ;;  %1937 = vmatpush3.bf16.msra.mxu0 %v992_v59  ;;  %v1906_v45 = vpop.f32.mrb[20].mxu0 }
 0x286   : > { %v954_v51 = vadd.f32 %v1874_v63, %v2878_v26  ;;  %v945_v0 = vpop.f32.mrb[5].mxu1  ;;  %v1130_v54 = vadd.f32 %v1906_v45, %v2873_v38  ;;  %v1121_v1 = vpop.f32.mrb[21].mxu0  ;;  %1938 = vmatprep.subr.bf16.mxu0 %v2408_v32  ;;  %1918 = vmatprep.subr.bf16.mxu1 %v2408_v32 }
 0x287   : > { %v946_v56 = vadd.f32 %v2878_v26, %v945_v0  ;;  %v1875_v3 = vpop.f32.mrb[6].mxu1  ;;  %v1122_v5 = vadd.f32 %v2873_v38, %v1121_v1  ;;  %v1907_v6 = vpop.f32.mrb[22].mxu0 }
 0x288   : > { %v2911_v8 = vmul.f32 %v2789_v4, %v1130_v54  ;;  %v957_v10 = vadd.f32 %v1875_v3, %v2878_v26  ;;  %v948_v11 = vpop.f32.mrb[7].mxu1  ;;  %v1133_v13 = vadd.f32 %v1907_v6, %v2873_v38  ;;  %v1124_v15 = vpop.f32.mrb[23].mxu0 }
 0x289   : > { %v2916_v16 = vmul.f32 %v2794_v9, %v1122_v5  ;;  %v949_v18 = vadd.f32 %v2878_v26, %v948_v11  ;;  %v1125_v20 = vadd.f32 %v2873_v38, %v1124_v15  ;;  %1939 = vmatpush3.bf16.msra.mxu0 %v993_v55 }
 0x28a   : > { %v2920_v21 = vpack.c.bf16 %v957_v10, %v954_v51  ;;  %v2923_v22 = vmul.f32 %v2799_v14, %v1133_v13  ;;  %1940 = vmatprep.subr.bf16.mxu0 %v2408_v32 }
 0x28b   : > { %v994_v4 = vpack.c.bf16 %v949_v18, %v946_v56  ;;  %v2927_v23 = vmul.f32 %v2805_v19, %v1125_v20 }
 0x28c   : > { %v1187_v9 = vpack.c.bf16 %v2923_v22, %v2911_v8  ;;  %v2108_v22 = vld [vmem:[#allocation12] ss:$8 sps:$4 sm:$0xff]  }
 0x28d   : > { %v1186_v24 = vpack.c.bf16 %v2927_v23, %v2916_v16  ;;  %1919 = vmatpush3.bf16.xpose.msra.mxu1 %v993_v55  ;;  %1941 = vmatpush3.bf16.msra.mxu0 %v994_v4  ;;  %v1878_v25 = vpop.f32.mrb[8].mxu1  ;;  %v1910_v27 = vpop.f32.mrb[24].mxu0  ;;  %v2110_v23 = vld [vmem:[#allocation12 + $0x4] ss:$8 sps:$4 sm:$0xff]  }
 0x28e   : > { %1942 = vmatprep.subr.bf16.mxu0 %v2408_v32  ;;  %v970_v14 = vadd.f32 %v1878_v25, %v2878_v26  ;;  %v961_v28 = vpop.f32.mrb[9].mxu1  ;;  %1920 = vmatprep.subr.bf16.mxu1 %v2408_v32  ;;  %v1146_v19 = vadd.f32 %v1910_v27, %v2873_v38  ;;  %v1137_v29 = vpop.f32.mrb[25].mxu0 }
 0x28f   : > { %v962_v30 = vadd.f32 %v2878_v26, %v961_v28  ;;  %v1879_v35 = vpop.f32.mrb[10].mxu1  ;;  %v1138_v37 = vadd.f32 %v2873_v38, %v1137_v29  ;;  %v1911_v39 = vpop.f32.mrb[26].mxu0 }
 0x290   : > { %v973_v41 = vadd.f32 %v1879_v35, %v2878_v26  ;;  %v964_v42 = vpop.f32.mrb[11].mxu1  ;;  %v2941_v43 = vmul.f32 %v2817_v31, %v1146_v19  ;;  %v1149_v44 = vadd.f32 %v1911_v39, %v2873_v38  ;;  %v1140_v47 = vpop.f32.mrb[27].mxu0  ;;  %v2114_v35 = vld [vmem:[#allocation12 + $0x20] ss:$8 sps:$4 sm:$0xff]   ;;  %v2125_v39 = vld [vmem:[#allocation12 + $0x54] ss:$8 sps:$4 sm:$0xff]  }
 0x291   : > { %1943 = vmatpush3.bf16.msra.mxu0 %v2920_v21  ;;  %v965_v48 = vadd.f32 %v2878_v26, %v964_v42  ;;  %v2947_v49 = vmul.f32 %v2822_v40, %v1138_v37  ;;  %v1141_v50 = vadd.f32 %v2873_v38, %v1140_v47  ;;  %v2120_v37 = vld [vmem:[#allocation12 + $0x40] ss:$8 sps:$4 sm:$0xff]   ;;  %v2128_v42 = vld [vmem:[#allocation12 + $0x64] ss:$8 sps:$4 sm:$0xff]   ;;  %v2129_v47 = vld [vmem:[#allocation12 + $0x70] ss:$8 sps:$4 sm:$0xff]  }
 0x292   : > { %v997_v55 = vpack.c.bf16 %v973_v41, %v970_v14  ;;  %v1179_v59 = vmul.f32 %v2827_v46, %v1149_v44  ;;  %1944 = vmatprep.subr.bf16.mxu0 %v2408_v32  ;;  %v2123_v41 = vld [vmem:[#allocation12 + $0x50] ss:$8 sps:$4 sm:$0xff]   ;;  %v2131_v44 = vld [vmem:[#allocation12 + $0x74] ss:$8 sps:$4 sm:$0xff]  }
 0x293   : > { %v996_v63 = vpack.c.bf16 %v965_v48, %v962_v30  ;;  %v1177_v31 = vmul.f32 %v2835_v52, %v1141_v50  ;;  %v2116_v30 = vld [vmem:[#allocation12 + $0x24] ss:$8 sps:$4 sm:$0xff]   ;;  %v2410_v48 = vmov 0  }
 0x294   : > { %v1189_v45 = vpack.c.bf16 %v1179_v59, %v2941_v43  ;;  %v2126_v43 = vld [vmem:[#allocation12 + $0x60] ss:$8 sps:$4 sm:$0xff]  }
 0x295   : > { %1921 = vmatpush3.bf16.xpose.msra.mxu1 %v994_v4  ;;  %v1188_v51 = vpack.c.bf16 %v1177_v31, %v2947_v49  ;;  %1945 = vmatpush3.bf16.msra.mxu0 %v996_v63  ;;  %v1882_v0 = vpop.f32.mrb[12].mxu1  ;;  %v1914_v54 = vpop.f32.mrb[28].mxu0 }
 0x296   : > { %1922 = vmatprep.subr.bf16.mxu1 %v2408_v32  ;;  %1946 = vmatprep.subr.bf16.mxu0 %v2408_v32  ;;  %v986_v40 = vadd.f32 %v1882_v0, %v2878_v26  ;;  %v977_v46 = vpop.f32.mrb[13].mxu1  ;;  %v1162_v1 = vadd.f32 %v1914_v54, %v2873_v38  ;;  %v1153_v56 = vpop.f32.mrb[29].mxu0  ;;  %v1307_v54 = vsub.s32 0, %v2743_v34 }
 0x297   : > { %v978_v52 = vadd.f32 %v2878_v26, %v977_v46  ;;  %v1883_v3 = vpop.f32.mrb[14].mxu1  ;;  %v1154_v5 = vadd.f32 %v2873_v38, %v1153_v56  ;;  %v1915_v6 = vpop.f32.mrb[30].mxu0  ;;  %v1311_v46 = vsub.s32 1, %v2743_v34 }
 0x298   : > { %v989_v10 = vadd.f32 %v1883_v3, %v2878_v26  ;;  %v980_v11 = vpop.f32.mrb[15].mxu1  ;;  %v1182_v13 = vmul.f32 %v2847_v2, %v1162_v1  ;;  %v1165_v15 = vadd.f32 %v1915_v6, %v2873_v38  ;;  %v1156_v18 = vpop.f32.mrb[31].mxu0 }
 0x299   : > { %1947 = vmatpush3.bf16.msra.mxu0 %v997_v55  ;;  %v981_v20 = vadd.f32 %v2878_v26, %v980_v11  ;;  %v1180_v4 = vmul.f32 %v2852_v7, %v1154_v5  ;;  %v1157_v25 = vadd.f32 %v2873_v38, %v1156_v18  ;;  %v1192_v7 = vld [vmem:[%s3091_s8] sm:$0xf] }
 0x29a   : > { %v999_v27 = vpack.c.bf16 %v989_v10, %v986_v40  ;;  %v1183_v14 = vmul.f32 %v2856_v12, %v1165_v15  ;;  %1948 = vmatprep.subr.bf16.mxu0 %v2408_v32  ;;  %v1303_v40 = vld [vmem:[%s3122_s22] sm:$0x3] }
 0x29b   : > { %v998_v28 = vpack.c.bf16 %v981_v20, %v978_v52  ;;  %v1181_v19 = vmul.f32 %v2861_v17, %v1157_v25  ;;  %v1308_v1 = vrot.slane %v1303_v40, %v1307_v54  ;;  %v1312_v56 = vrot.slane %v1303_v40, %v1311_v46 }
 0x29c   : > { %v1191_v29 = vpack.c.bf16 %v1183_v14, %v1182_v13 }
 0x29d   : > { %1923 = vmatpush3.bf16.xpose.msra.mxu1 %v2920_v21  ;;  %v1190_v2 = vpack.c.bf16 %v1181_v19, %v1180_v4  ;;  %1949 = vmatpush3.bf16.msra.mxu0 %v998_v28 }
 0x29e   : > { %1924 = vmatprep.subr.bf16.mxu1 %v2408_v32  ;;  %1950 = vmatprep.subr.bf16.mxu0 %v2408_v32 }
 0x2a1   : > { %1951 = vmatpush3.bf16.msra.mxu0 %v999_v27 }
 0x2a2   : > { %1395 = vmatprep.subr.bf16.mxu0 %v2110_v23 }
 0x2a5   : > { %1925 = vmatpush3.bf16.xpose.msra.mxu1 %v996_v63 }
 0x2a6   : > { %1926 = vmatprep.subr.bf16.mxu1 %v2408_v32 }
 0x2ad   : > { %1927 = vmatpush3.bf16.xpose.msra.mxu1 %v997_v55 }
 0x2ae   : > { %1928 = vmatprep.subr.bf16.mxu1 %v2408_v32 }
 0x2b5   : > { %1929 = vmatpush3.bf16.xpose.msra.mxu1 %v998_v28 }
 0x2b6   : > { %1930 = vmatprep.subr.bf16.mxu1 %v2408_v32 }
 0x2bd   : > { %1931 = vmatpush3.bf16.xpose.msra.mxu1 %v999_v27 }
 0x2be   : > { %1956 = vmatprep.subr.bf16.mxu1 %v2408_v32 }
 0x2c4   : > { %1933 = vmatmul.mubr.bf16.vlgmr.msra.gmra.mrb[16].mxu1 %v1192_v7 }
 0x2c5   : > { %1957 = vmatpush3.bf16.xpose.msra.mxu1 %v1184_v62  ;;  %1972 = vmatprep.mubr.msk.bf16.mxu1 %vm2409_vm0, %v2408_v32 }
 0x2c6   : > { %1958 = vmatprep.subr.bf16.mxu1 %v2408_v32 }
 0x2cd   : > { %1959 = vmatpush3.bf16.xpose.msra.mxu1 %v1185_v61  ;;  %v564_v61 = vand.u32 127, %v497_v33  ;;  %v2119_v33 = vld [vmem:[#allocation12 + $0x34] ss:$8 sps:$4 sm:$0xff]  }
 0x2ce   : > { %1960 = vmatprep.subr.bf16.mxu1 %v2408_v32 }
 0x2cf   : > { %vm565_vm1 = vcmp.lt.s32.totalorder %v564_v61, %v2746_v36  ;;  %v2117_v36 = vld [vmem:[#allocation12 + $0x30] ss:$8 sps:$4 sm:$0xff]  }
 0x2d0   : > { %v1686_v62 = vsel %vm565_vm1, 1.0, %v2408_v32 }
 0x2d5   : > { %1961 = vmatpush3.bf16.xpose.msra.mxu1 %v1186_v24  ;;  %v2111_v24 = vld [vmem:[#allocation12 + $0x10] ss:$8 sps:$4 sm:$0xff]  }
 0x2d6   : > { %1962 = vmatprep.subr.bf16.mxu1 %v2408_v32 }
 0x2dd   : > { %1963 = vmatpush3.bf16.xpose.msra.mxu1 %v1187_v9  ;;  %v2113_v9 = vld [vmem:[#allocation12 + $0x14] ss:$8 sps:$4 sm:$0xff]  }
 0x2de   : > { %1964 = vmatprep.subr.bf16.mxu1 %v2408_v32 }
 0x2e5   : > { %1965 = vmatpush3.bf16.xpose.msra.mxu1 %v1188_v51 }
 0x2e6   : > { %1966 = vmatprep.subr.bf16.mxu1 %v2408_v32 }
 0x2ed   : > { %1967 = vmatpush3.bf16.xpose.msra.mxu1 %v1189_v45 }
 0x2ee   : > { %1968 = vmatprep.subr.bf16.mxu1 %v2408_v32 }
 0x2f5   : > { %1969 = vmatpush3.bf16.xpose.msra.mxu1 %v1190_v2 }
 0x2f6   : > { %1970 = vmatprep.subr.bf16.mxu1 %v2408_v32  ;;  %v2122_v32 = vld [vmem:[#allocation12 + $0x44] ss:$8 sps:$4 sm:$0xff]  }
 0x2fd   : > { %1971 = vmatpush3.bf16.xpose.msra.mxu1 %v1191_v29 }
 0x397   : > { %v1227_v12 = vpop.f32.mrb[16].mxu1 }
 0x398   : > { %v1233_v17 = vmul.f32 0.088388346, %v1227_v12  ;;  %v1934_v38 = vpop.f32.mrb[17].mxu1 }
 0x399   : > { %v1230_v26 = vpop.f32.mrb[18].mxu1 }
 0x39a   : > { %1234 = vmax.xlane.f32.xlu0 %v1233_v17  ;;  %v1935_v53 = vpop.f32.mrb[19].mxu1 }
 0x427   : > { %v1235_v57 = vpop.xlane.xlu0 %1234 }
 0x428   : > { %v1236_v58 = vsub.f32 %v1233_v17, %v1235_v57 }
 0x42a   : > { %v1237_v60 = vmul.f32 1.442695, %v1236_v58 }
 0x42c   : > { %2132 = vpow2.f32 %v1237_v60 }
 0x436   : > { %v2133_v8 = vpop.eup %2132 }
 0x437   : > { %v1239_v16 = vmul.f32 %v2133_v8, %v1686_v62 }
 0x439   : > { %1240 = vadd.xlane.f32.xlu0 %v1239_v16  ;;  %v1244_v21 = vpack.c.bf16 %v1239_v16, %v1239_v16 }
 0x43b   : > { %1953 = vmatmul.mubr.bf16.vlgmr.msra.gmra.mrb[32].mxu0 %v1244_v21 }
 0x43c   : > { %1396 = vmatpush1.bf16.msra.mxu0 %v2108_v22  ;;  %1427 = vmatprep.mubr.bf16.mxu0 %v2410_v48 }
 0x43d   : > { %1397 = vmatprep.subr.bf16.mxu0 %v2113_v9 }
 0x440   : > { %1398 = vmatpush1.bf16.msra.mxu0 %v2111_v24 }
 0x441   : > { %1399 = vmatprep.subr.bf16.mxu0 %v2116_v30 }
 0x444   : > { %1400 = vmatpush1.bf16.msra.mxu0 %v2114_v35 }
 0x445   : > { %1401 = vmatprep.subr.bf16.mxu0 %v2119_v33 }
 0x448   : > { %1402 = vmatpush1.bf16.msra.mxu0 %v2117_v36 }
 0x449   : > { %1403 = vmatprep.subr.bf16.mxu0 %v2122_v32 }
 0x44c   : > { %1404 = vmatpush1.bf16.msra.mxu0 %v2120_v37 }
 0x44d   : > { %1405 = vmatprep.subr.bf16.mxu0 %v2125_v39 }
 0x450   : > { %1406 = vmatpush1.bf16.msra.mxu0 %v2123_v41 }
 0x451   : > { %1407 = vmatprep.subr.bf16.mxu0 %v2128_v42 }
 0x454   : > { %1408 = vmatpush1.bf16.msra.mxu0 %v2126_v43 }
 0x455   : > { %1409 = vmatprep.subr.bf16.mxu0 %v2131_v44 }
 0x458   : > { %1410 = vmatpush1.bf16.msra.mxu0 %v2129_v47 }
 0x4c6   : > { %v1241_v49 = vpop.xlane.xlu0 %1240 }
 0x4c7   : > { %v1242_v50 = vmax.f32 %v1241_v49, 1e-20 }
 0x4c9   : > { %2134 = vrcp.f32 %v1242_v50 }
 0x4d3   : > { %v2135_v55 = vpop.eup %2134 }
 0x50e   : > { %v1279_v59 = vpop.f32.mrb[32].mxu0 }
 0x50f   : > { %v1285_v63 = vmul.f32 %v2135_v55, %v1279_v59  ;;  %v1954_v31 = vpop.f32.mrb[33].mxu0 }
 0x510   : > { %v1282_v45 = vpop.f32.mrb[34].mxu0 }
 0x511   : > { %v1286_v51 = vpack.c.bf16 %v1285_v63, %v1285_v63  ;;  %v1955_v0 = vpop.f32.mrb[35].mxu0 }
 0x513   : > { %1428 = vmatmul.mubr.bf16.vlgmr.msra.gmra.mrb[36].mxu0 %v1286_v51 }
 0x5e6   : > { %v1429_v52 = vpop.f32.mrb[36].mxu0 }
 0x5e7   : > { %v1430_v3 = vadd.f32 %v1429_v52, %v1308_v1  ;;  %v1431_v5 = vpop.f32.mrb[37].mxu0 }
 0x5e8   : > { %v1432_v6 = vadd.f32 %v1431_v5, %v1312_v56  ;;  %v1433_v10 = vpop.f32.mrb[38].mxu0 }
 0x5e9   : > { %1436 = vst [vmem:[%s471_s23] sm:$0xff] %v1430_v3  ;;  %v1434_v11 = vpop.f32.mrb[39].mxu0 }
 0x5ea   : > { %v1437_v13 = vpack.c.bf16 %v1432_v6, %v1432_v6 }
 0x5ec   : > { %1973 = vmatmul.mubr.bf16.vlgmr.msra.gmra.mrb[20].mxu1 %v1437_v13 }
 0x5ed   : > { %2301 = shalt.err (!%p2298_p2)
}
 0x5ee   : > { %s2302_s22 = scalar_lea.hbm %s3014_s10, 128  ;;  %s2306_s18 = scalar_lea.hbm %s3123_s25, 256 }
 0x5ef   : > { %p2303_p12 = scmp.ne.s32.totalorder %s3014_s10, %s2302_s22  ;;  %p2307_p7 = scmp.lt.u32.totalorder %s3014_s10, %s3123_s25 }
 0x5f0   : > { %p2308_p11 = scmp.lt.u32.totalorder %s2306_s18, %s2302_s22  ;;  %p2310_p13 = scmp.lt.u32.totalorder %s2302_s22, %s3014_s10 }
 0x5f1   : > { %p2304_p3 = pnand %p2303_p12, %p2661_p6 }
 0x5f2   : > { %p2309_p9 = por %p2308_p11, %p2307_p7 }
 0x5f3   : > { %p2305_p0 = pneg %p2304_p3 }
 0x5f4   : > { %p2311_p8 = por %p2310_p13, %p2309_p9 }
 0x5f6   : > { %p2312_p10 = pnand %p2311_p8, %p2305_p0 }
 0x5f8   : > { %2315 = shalt.err (!%p2312_p10)
}
 0x5f9   : > { %1994 = dma.vmem_to_hbm [thread:$0]  (%p2661_p6), %s1500_s20, 128, %s3014_s10, %s1481_s11  }
 0x5fa   : > { %s1669_s17 = sshll.u32 %s2713_s21, 2  ;;  %s1741_s28 = sshll.u32 %s2511_s0, 6 }
 0x5fb   : > { %s478_s12 = scalar_lea.vmem [#allocation14], %s1669_s17  ;;  %s3124_s23 = sld [smem:[#allocation26_spill]] }
 0x5fc   : > { %s1512_s27 = sshll.u32 %s478_s12, 4  ;;  %s1486_s20 = scalar_lea.sflag [#allocation15], %s2713_s21  ;;  %s3041_s27 = int_to_ptr.vmem [resolvable:$true] %s1512_s27 }
 0x5fd   : > { %s2316_s0 = scalar_lea.vmem %s3041_s27, 64  ;;  %s2412_s10 = smov [#allocation14]  }
 0x5fe   : > { %p2317_p1 = scmp.ne.s32.totalorder %s3041_s27, %s2316_s0  ;;  %s2320_s11 = sshll.u32 %s2412_s10, 4  ;;  %s2321_s11 = int_to_ptr.vmem [resolvable:$false] %s2320_s11 }
 0x5ff   : > { %s2322_s29 = scalar_lea.vmem %s2321_s11, 128  ;;  %p2323_p2 = scmp.lt.s32.totalorder %s3041_s27, %s2321_s11 }
 0x600   : > { %p2318_p4 = pnand %p2317_p1, %p2661_p6  ;;  %p2324_p12 = scmp.lt.s32.totalorder %s2322_s29, %s2316_s0 }
 0x601   : > { %s3039_s18 = scalar_lea.hbm %s3124_s23, %s1741_s28 }
 0x602   : > { %p2319_p5 = pneg %p2318_p4  ;;  %p2325_p3 = por %p2324_p12, %p2323_p2 }
 0x604   : > { %p2326_p0 = pnand %p2325_p3, %p2319_p5 }
 0x6bf   : > { %v1472_v34 = vpop.f32.mrb[20].mxu1 }
 0x6c0   : > { %v1478_v15 = vpack.c.bf16 %v1472_v34, %v1472_v34  ;;  %v1974_v18 = vpop.f32.mrb[21].mxu1 }
 0x6c1   : > { %v1475_v20 = vpop.f32.mrb[22].mxu1 }
 0x6c2   : > { %1479 = vst [vmem:[%s478_s12] sm:$0xf] %v1478_v15  ;;  %v1975_v4 = vpop.f32.mrb[23].mxu1 }
 0x6c3   : > { %2329 = shalt.err (!%p2326_p0)
}
 0x6c4   : > { %s2330_s21 = scalar_lea.hbm %s3039_s18, 64  ;;  %s2334_s28 = scalar_lea.hbm %s3124_s23, 128 }
 0x6c5   : > { %p2331_p7 = scmp.ne.s32.totalorder %s3039_s18, %s2330_s21  ;;  %p2335_p13 = scmp.lt.u32.totalorder %s3039_s18, %s3124_s23 }
 0x6c6   : > { %p2336_p8 = scmp.lt.u32.totalorder %s2334_s28, %s2330_s21  ;;  %p2338_p1 = scmp.lt.u32.totalorder %s2330_s21, %s3039_s18 }
 0x6c7   : > { %p2332_p11 = pnand %p2331_p7, %p2661_p6 }
 0x6c8   : > { %p2337_p10 = por %p2336_p8, %p2335_p13 }
 0x6c9   : > { %p2333_p9 = pneg %p2332_p11 }
 0x6ca   : > { %p2339_p4 = por %p2338_p1, %p2337_p10 }
 0x6cc   : > { %p2340_p5 = pnand %p2339_p4, %p2333_p9 }
 0x6ce   : > { %2343 = shalt.err (!%p2340_p5)
}
 0x6cf   : > { %1995 = dma.vmem_to_hbm [thread:$0]  (%p2661_p6), %s3041_s27, 64, %s3039_s18, %s1486_s20  }
 0x6d0 PF: > { %s3125_s22 = sld [smem:[#allocation22_spill]]  ;;  %s3126_s0 = sld [smem:[#allocation23_spill]] }
 0x6d1   : > { %p3128_p12 = scmp.ge.s32.totalorder %s2396_s16, 2 }
 0x6d6   : > { %s1524_s10 = sand.u32 1, %s3125_s22   ;;  %p3127_p2 = scmp.ne.s32.totalorder %s3126_s0, 0 }
 0x6d7   : > { %s1525_s11 = scalar_lea.sflag [#allocation6], %s1524_s10 }
 0x6d8   : > { %p2016_p3 = pnand %p3128_p12, %p3127_p2 }
 0x6da   : > { %2375 = dma.done.wait (!%p2016_p3), %s1525_s11, 128  }
 0x6db   : > { %2377 = vsyncadd (!%p2016_p3), %s1525_s11, 4294967168  ;;  %s1534_s29 = scalar_lea.sflag [#allocation15], %s1524_s10 }
 0x6dc   : > { %2379 = dma.done.wait (!%p2016_p3), %s1534_s29, 64  }
 0x6dd   : > { %2381 = vsyncadd (!%p2016_p3), %s1534_s29, 4294967232  ;;  %s3129_s26 = smov %s2648_s13  ;;  %p35_p6 = scmp.ge.s32.totalorder %s2648_s13, 4  }
 0x6de   : > { %s3130_s13 = smov %s2388_s14  ;;  %s3131_s14 = smov %s2392_s15 }
 0x6df   : > { %s3132_s15 = smov %s2657_s24  ;;  %s3133_s16 = smov %s3129_s26 }
 0x6e0   :  { %37 = sbr.rel (!%p35_p6) target bundleno = 22 (0x16), region = 138 }
 0x6e7   :  { %1539 = vsyncpa [#allocation5], 1 }
 0x6e8   :  { %1541 = vsyncpa [#allocation5 + $0x1], 1 }
 0x6e9   :  { %1542 = vsyncpa [#allocation8], 1 }
 0x6ea   :  { %1543 = vsyncpa [#allocation11], 1 }
 0x6eb   :  { %1544 = vsyncpa [#allocation6], 1 }
 0x6ec   :  { %1546 = vsyncpa [#allocation6 + $0x1], 1 }
 0x6ed   :  { %1547 = vsyncpa [#allocation15], 1 }
 0x6ee   :  { %1549 = vsyncpa [#allocation15 + $0x1], 1 }

</bundles_post_ra>
